<compile_context>
chip_gen: v7x
topology: tpu7x:2x2x1
jax: 0.10.0
libtpu: 0.0.40
codegen_flags: <defaults>
</compile_context>

<pallas_src>
import functools
import math

import jax
import jax.numpy as jnp
import numpy as np
from jax import lax
from jax.experimental import pallas as pl
from jax.experimental.pallas import tpu as pltpu

_NEG = -1e30       # stand-in for -inf (keeps all arithmetic finite)
_B_TILE = 8        # batches processed per grid step (one sublane each)
_LANE = 128


def _round_up(v, m):
    return (v + m - 1) // m * m


def _monotonic_align_kernel(y_lens_sref,     # SMEM (Bp,) int32   (scalar prefetch)
                            xaug_ref,        # VMEM (8, Kp, TXp)  matmul dtype
                            yaugT_ref,       # VMEM (8, TYp, Kp)  matmul dtype
                            xlen_ref,        # VMEM (8, 1) int32
                            ylen_ref,        # VMEM (8, 1) int32
                            out_ref,         # VMEM (8, TXp, TYp) out dtype
                            prior_ref,       # VMEM (8*TYp, TXp) f32  batch-major log-prior
                            cmp_ref,         # VMEM (TYp, 8, TXp) f32 per-frame backtrack flags
                            *, typ, txp):
    g = pl.program_id(0)

    # ---- per-tile maximum number of mel frames (scalar loop bound, SMEM) ----
    ty_max = y_lens_sref[g * _B_TILE]
    for i in range(1, _B_TILE):
        ty_max = jnp.maximum(ty_max, y_lens_sref[g * _B_TILE + i])

    # ---- log-prior via MXU: one augmented matmul per batch, chunked over
    #      frames (bounds vreg pressure); contiguous batch-major stores. ----
    mm_chunk = min(typ, 128)
    dims = (((1,), (0,)), ((), ()))
    for b in range(_B_TILE):                                   # static unroll
        xb = xaug_ref[b]                                       # (Kp, TXp)
        for c in range(0, typ, mm_chunk):
            yb = yaugT_ref[b, pl.ds(c, mm_chunk), :]           # (chunk, Kp)
            prior_ref[pl.ds(b * typ + c, mm_chunk), :] = lax.dot_general(
                yb, xb, dims, preferred_element_type=jnp.float32)

    lane = lax.broadcasted_iota(jnp.int32, (1, txp), 1)        # text index x
    frame = lax.broadcasted_iota(jnp.int32, (1, typ), 1)       # mel frame index yy
    subl = lax.broadcasted_iota(jnp.int32, (_B_TILE, 1), 0)    # batch index in tile

    def prior_slab(yy):
        # (8, TXp) slab: log-prior row `yy` for every batch of the tile.
        acc = jnp.zeros((_B_TILE, txp), jnp.float32)
        for b in range(_B_TILE):                               # static unroll
            row = prior_ref[pl.ds(b * typ + yy, 1), :]         # (1, TXp)
            acc = jnp.where(subl == b, row, acc)
        return acc

    # Hygiene: frame 0 has no "previous row" comparison (gated by idx != 0
    # in backtracking), but zero it so we never read uninitialized VMEM.
    cmp_ref[0] = jnp.zeros((_B_TILE, txp), jnp.float32)

    # ---- forward DP over mel frames, all 8 batches in the sublanes.
    #      prev row is carried in vregs; only the 1-bit backtrack decision
    #      (as f32 0/1) is persisted per frame. ----
    row0 = prior_slab(0)

    def fwd_body(yy, prev):                                    # prev carried in vregs
        shifted = pltpu.roll(prev, shift=1, axis=1)            # prev[x-1] (XLU)
        # value[x, yy-1] < value[x-1, yy-1]  (reuses the roll already needed)
        cmp_ref[yy] = (prev < shifted).astype(jnp.float32)
        v_prev = jnp.where(lane == 0, _NEG, shifted)
        v_cur = jnp.where(lane == yy, _NEG, prev)
        return prior_slab(yy) + jnp.maximum(v_cur, v_prev)

    lax.fori_loop(1, ty_max, fwd_body, row0)

    # ---- backtracking, vectorised across the 8 batches ----
    tx_col = xlen_ref[...]                                     # (8, 1) int32
    ty_col = ylen_ref[...]                                     # (8, 1) int32
    idx0 = tx_col - 1
    tab0 = jnp.full((_B_TILE, typ), -1, jnp.int32)             # chosen index per frame

    def bwd_body(i, carry):
        idx, tab = carry
        yy = ty_max - 1 - i
        active = yy < ty_col                                   # (8, 1) bool
        rec = jnp.where(active, idx, -1)
        tab = jnp.where(frame == yy, rec, tab)                 # record chosen index
        crow = cmp_ref[yy]                                     # (8, TXp) precomputed flags
        hit = jnp.sum(jnp.where(lane == idx, crow, 0.0),
                      axis=1, keepdims=True)                   # single masked reduce
        dec = active & (idx != 0) & ((idx == yy) | (hit > 0.0))
        return idx - dec.astype(jnp.int32), tab

    _, idx_tab = lax.fori_loop(0, ty_max, bwd_body, (idx0, tab0))

    # ---- bulk one-hot emission, lane-dense, directly in (b, T_x, T_y) layout,
    #      chunked to keep live vreg footprint bounded. ----
    em_rx = min(txp, 128)
    em_cy = min(typ, 512)
    base_iota = lax.broadcasted_iota(jnp.int32, (em_rx, em_cy), 0)
    for b in range(_B_TILE):                                   # static unroll
        idx_row = idx_tab[b:b + 1, :]                          # (1, TYp)
        for cx in range(0, txp, em_rx):
            xi = base_iota + cx
            for cy in range(0, typ, em_cy):
                ir = idx_row[:, cy:cy + em_cy]                 # (1, em_cy)
                out_ref[b, pl.ds(cx, em_rx), pl.ds(cy, em_cy)] = (
                    xi == ir).astype(out_ref.dtype)


def monotonic_align(x, x_lens, y, y_lens, ndim, *, matmul_dtype=jnp.bfloat16):
    """JAX/Pallas equivalent of MonotonicAlign(ndim).forward(x, x_lens, y, y_lens).

    x: (B, C, T_x), y: (B, C, T_y), x_lens/y_lens: (B,) ints.
    Returns attn: (B, T_x, T_y) hard 0/1 alignment, dtype of x.
    """
    B, C, TX = x.shape
    TY = y.shape[2]
    out_dtype = x.dtype

    TXp = _round_up(TX, _LANE)
    TYp = _round_up(TY, _LANE)
    Bp = _round_up(B, _B_TILE)
    k_align = 16 if matmul_dtype == jnp.bfloat16 else 8
    Kp = _round_up(C + 2, k_align)

    xf = x.astype(jnp.float32)
    yf = y.astype(jnp.float32)
    const = -0.5 * math.log(2.0 * math.pi) * ndim

    # Augmented channel dim so the full log-prior is one matmul per batch:
    # log_prior[ty,tx] = sum_c y*x + (-0.5*sum_c y^2) + (-0.5*sum_c x^2 + const)
    x_aug = jnp.concatenate(
        [xf,
         jnp.ones((B, 1, TX), jnp.float32),
         -0.5 * jnp.sum(xf * xf, axis=1, keepdims=True) + const], axis=1)
    y_aug = jnp.concatenate(
        [yf,
         -0.5 * jnp.sum(yf * yf, axis=1, keepdims=True),
         jnp.ones((B, 1, TY), jnp.float32)], axis=1)

    x_aug = jnp.pad(x_aug, ((0, Bp - B), (0, Kp - (C + 2)), (0, TXp - TX)))
    y_aug = jnp.pad(y_aug, ((0, Bp - B), (0, Kp - (C + 2)), (0, TYp - TY)))
    x_aug = x_aug.astype(matmul_dtype)                        # (Bp, Kp, TXp)
    y_augT = jnp.swapaxes(y_aug, 1, 2).astype(matmul_dtype)   # (Bp, TYp, Kp)

    xl = jnp.pad(x_lens.astype(jnp.int32), (0, Bp - B))
    yl = jnp.pad(y_lens.astype(jnp.int32), (0, Bp - B))

    kernel = functools.partial(_monotonic_align_kernel, typ=TYp, txp=TXp)

    # Single-buffer the (large) output block to save VMEM (v7x has only 64 MiB);
    # the per-tile DP loop is long so losing writeback overlap is cheap.
    out_block_bytes = _B_TILE * TXp * TYp * np.dtype(out_dtype).itemsize
    out_index = lambda g, yls: (g, 0, 0)
    if out_block_bytes > (8 << 20):
        out_spec = pl.BlockSpec((_B_TILE, TXp, TYp), out_index,
                                pipeline_mode=pl.Buffered(1))
        out_bufs = 1
    else:
        out_spec = pl.BlockSpec((_B_TILE, TXp, TYp), out_index)
        out_bufs = 2

    grid_spec = pltpu.PrefetchScalarGridSpec(
        num_scalar_prefetch=1,                     # y_lens in SMEM (loop bounds)
        grid=(Bp // _B_TILE,),
        in_specs=[
            pl.BlockSpec((_B_TILE, Kp, TXp), lambda g, yls: (g, 0, 0)),
            pl.BlockSpec((_B_TILE, TYp, Kp), lambda g, yls: (g, 0, 0)),
            pl.BlockSpec((_B_TILE, 1), lambda g, yls: (g, 0)),
            pl.BlockSpec((_B_TILE, 1), lambda g, yls: (g, 0)),
        ],
        out_specs=out_spec,
        scratch_shapes=[
            pltpu.VMEM((_B_TILE * TYp, TXp), jnp.float32),   # batch-major log-prior
            pltpu.VMEM((TYp, _B_TILE, TXp), jnp.float32),    # per-frame backtrack flags
        ],
    )

    # VMEM budget derived from the device (v7x: 64 MiB, v5e/v6e: 128 MiB).
    itm = np.dtype(matmul_dtype).itemsize
    scratch_bytes = 4 * _B_TILE * TYp * TXp * 2
    in_bytes = 2 * (itm * _B_TILE * (Kp * TXp + TYp * Kp) + 2 * 4 * _B_TILE)
    needed = int(1.25 * (scratch_bytes + in_bytes + out_bufs * out_block_bytes)) + (2 << 20)
    try:
        cap = int(pltpu.get_tpu_info().vmem_capacity_bytes)
    except Exception:  # pragma: no cover - conservative fallback
        cap = 64 << 20
    vmem_limit = int(max(min(needed, cap - (8 << 20)), 16 << 20))

    # NOTE: for B <= 8 on v7x this is a single grid step (one core idle);
    # splitting into two half-full tiles only pays off on 2-TC chips.
    out = pl.pallas_call(
        kernel,
        grid_spec=grid_spec,
        out_shape=jax.ShapeDtypeStruct((Bp, TXp, TYp), out_dtype),
        compiler_params=pltpu.CompilerParams(
            dimension_semantics=("parallel",),     # batch tiles are independent
            vmem_limit_bytes=vmem_limit,
        ),
    )(yl, x_aug, y_augT, xl.reshape(Bp, 1), yl.reshape(Bp, 1))

    return out[:B, :TX, :TY]


# ---------------- numpy reference (straight port of the torch/cython code) ----
def _reference(x, x_lens, y, y_lens, ndim):
    B, C, TX = x.shape
    TY = y.shape[2]
    const = -0.5 * math.log(2.0 * math.pi) * ndim
    factor = -0.5 * np.ones_like(x)
    y_square = np.matmul(np.transpose(factor, (0, 2, 1)), y ** 2)
    y_mu_double = np.matmul(np.transpose(2.0 * factor * x, (0, 2, 1)), y)
    mu_square = np.sum(factor * x ** 2, axis=1)[..., None]
    log_prior = y_square - y_mu_double + mu_square + const          # (B, TX, TY)

    path = np.zeros((B, TX, TY), dtype=np.float32)
    neg = -1e30
    for b in range(B):
        tx, ty = int(x_lens[b]), int(y_lens[b])
        value = log_prior[b].copy()
        for yy in range(ty):
            for xx in range(max(0, tx + yy - ty), min(tx, yy + 1)):
                v_cur = neg if xx == yy else value[xx, yy - 1]
                if xx == 0:
                    v_prev = 0.0 if yy == 0 else neg
                else:
                    v_prev = value[xx - 1, yy - 1]
                value[xx, yy] = max(v_cur, v_prev) + value[xx, yy]
        idx = tx - 1
        for yy in range(ty - 1, -1, -1):
            path[b, idx, yy] = 1.0
            if idx != 0 and (idx == yy or value[idx, yy - 1] < value[idx - 1, yy - 1]):
                idx -= 1
    return log_prior, path


if __name__ == "__main__":
    B, C, TX, TY = 2, 4, 8, 16
    ndim = C

    key = jax.random.PRNGKey(0)
    kx, ky = jax.random.split(key)
    x = jax.random.normal(kx, (B, C, TX), dtype=jnp.float32)
    y = jax.random.normal(ky, (B, C, TY), dtype=jnp.float32)
    x_lens = jnp.array([TX, 6], dtype=jnp.int32)   # max(x_lens) == TX
    y_lens = jnp.array([TY, 11], dtype=jnp.int32)  # max(y_lens) == TY

    attn = jax.block_until_ready(monotonic_align(x, x_lens, y, y_lens, ndim))

    # ---- validation: structure of the path + path score vs. reference ----
    attn_np = np.asarray(attn)
    lp_ref, path_ref = _reference(np.asarray(x), np.asarray(x_lens),
                                  np.asarray(y), np.asarray(y_lens), ndim)
    ok = attn_np.shape == (B, TX, TY) and attn_np.dtype == np.float32
    for b in range(B):
        tx, ty = int(x_lens[b]), int(y_lens[b])
        pb = attn_np[b]
        ok &= bool(np.all((pb == 0.0) | (pb == 1.0)))
        ok &= bool(np.all(pb[tx:, :] == 0.0)) and bool(np.all(pb[:, ty:] == 0.0))
        ok &= bool(np.all(pb[:tx, :ty].sum(axis=0) == 1.0))   # one text idx per frame
        ok &= bool(pb[0, 0] == 1.0) and bool(pb[tx - 1, ty - 1] == 1.0)
        rows = pb[:tx, :ty].argmax(axis=0)
        ok &= bool(np.all(np.diff(rows) >= 0)) and bool(np.all(np.diff(rows) <= 1))
        # path score vs. reference (bf16 matmul inputs -> allow small slack)
        s_kernel = float((pb * lp_ref[b]).sum())
        s_ref = float((path_ref[b] * lp_ref[b]).sum())
        ok &= abs(s_kernel - s_ref) <= 5e-2 * (1.0 + abs(s_ref))

    if not ok:
        raise SystemExit("validation failed")
    print("KERNEL_OK")
</pallas_src>

<mosaic_0001>
module attributes {stable_mosaic.version = 11 : i64} {
  func.func @_monotonic_align_kernel(%arg0: i32, %arg1: memref<8xi32, #tpu.memory_space<smem>>, %arg2: memref<8x16x128xbf16, #tpu.memory_space<vmem>>, %arg3: memref<8x128x16xbf16, #tpu.memory_space<vmem>>, %arg4: memref<8x1xi32, #tpu.memory_space<vmem>>, %arg5: memref<8x1xi32, #tpu.memory_space<vmem>>, %arg6: memref<8x128x128xf32, #tpu.memory_space<vmem>>, %arg7: memref<1024x128xf32, #tpu.memory_space<vmem>>, %arg8: memref<128x8x128xf32, #tpu.memory_space<vmem>>) attributes {dimension_semantics = [#tpu.dimension_semantics<parallel>], iteration_bounds = array<i64: 1>, scalar_prefetch = 1 : i64, scratch_operands = 2 : i64, tpu.core_type = #tpu.core_type<tc>, window_params = [{transform_indices = @transform_0, window_bounds = array<i64: 8, 16, 128>}, {transform_indices = @transform_1, window_bounds = array<i64: 8, 128, 16>}, {transform_indices = @transform_2, window_bounds = array<i64: 8, 1>}, {transform_indices = @transform_3, window_bounds = array<i64: 8, 1>}, {transform_indices = @transform_4, window_bounds = array<i64: 8, 128, 128>}]} {
    %c8_i32 = arith.constant 8 : i32
    %0 = arith.muli %arg0, %c8_i32 : i32
    %1 = arith.index_cast %0 : i32 to index
    %2 = memref.load %arg1[%1] : memref<8xi32, #tpu.memory_space<smem>>
    %c8_i32_0 = arith.constant 8 : i32
    %3 = arith.muli %arg0, %c8_i32_0 : i32
    %c1_i32 = arith.constant 1 : i32
    %4 = arith.addi %3, %c1_i32 : i32
    %5 = arith.index_cast %4 : i32 to index
    %6 = memref.load %arg1[%5] : memref<8xi32, #tpu.memory_space<smem>>
    %7 = arith.maxsi %2, %6 : i32
    %c8_i32_1 = arith.constant 8 : i32
    %8 = arith.muli %arg0, %c8_i32_1 : i32
    %c2_i32 = arith.constant 2 : i32
    %9 = arith.addi %8, %c2_i32 : i32
    %10 = arith.index_cast %9 : i32 to index
    %11 = memref.load %arg1[%10] : memref<8xi32, #tpu.memory_space<smem>>
    %12 = arith.maxsi %7, %11 : i32
    %c8_i32_2 = arith.constant 8 : i32
    %13 = arith.muli %arg0, %c8_i32_2 : i32
    %c3_i32 = arith.constant 3 : i32
    %14 = arith.addi %13, %c3_i32 : i32
    %15 = arith.index_cast %14 : i32 to index
    %16 = memref.load %arg1[%15] : memref<8xi32, #tpu.memory_space<smem>>
    %17 = arith.maxsi %12, %16 : i32
    %c8_i32_3 = arith.constant 8 : i32
    %18 = arith.muli %arg0, %c8_i32_3 : i32
    %c4_i32 = arith.constant 4 : i32
    %19 = arith.addi %18, %c4_i32 : i32
    %20 = arith.index_cast %19 : i32 to index
    %21 = memref.load %arg1[%20] : memref<8xi32, #tpu.memory_space<smem>>
    %22 = arith.maxsi %17, %21 : i32
    %c8_i32_4 = arith.constant 8 : i32
    %23 = arith.muli %arg0, %c8_i32_4 : i32
    %c5_i32 = arith.constant 5 : i32
    %24 = arith.addi %23, %c5_i32 : i32
    %25 = arith.index_cast %24 : i32 to index
    %26 = memref.load %arg1[%25] : memref<8xi32, #tpu.memory_space<smem>>
    %27 = arith.maxsi %22, %26 : i32
    %c8_i32_5 = arith.constant 8 : i32
    %28 = arith.muli %arg0, %c8_i32_5 : i32
    %c6_i32 = arith.constant 6 : i32
    %29 = arith.addi %28, %c6_i32 : i32
    %30 = arith.index_cast %29 : i32 to index
    %31 = memref.load %arg1[%30] : memref<8xi32, #tpu.memory_space<smem>>
    %32 = arith.maxsi %27, %31 : i32
    %c8_i32_6 = arith.constant 8 : i32
    %33 = arith.muli %arg0, %c8_i32_6 : i32
    %c7_i32 = arith.constant 7 : i32
    %34 = arith.addi %33, %c7_i32 : i32
    %35 = arith.index_cast %34 : i32 to index
    %36 = memref.load %arg1[%35] : memref<8xi32, #tpu.memory_space<smem>>
    %37 = arith.maxsi %32, %36 : i32
    %c0 = arith.constant 0 : index
    %c0_7 = arith.constant 0 : index
    %c0_8 = arith.constant 0 : index
    %38 = vector.load %arg2[%c0, %c0_7, %c0_8] : memref<8x16x128xbf16, #tpu.memory_space<vmem>>, vector<1x16x128xbf16>
    %39 = vector.shape_cast %38 : vector<1x16x128xbf16> to vector<16x128xbf16>
    %c0_9 = arith.constant 0 : index
    %c0_10 = arith.constant 0 : index
    %c0_11 = arith.constant 0 : index
    %40 = vector.load %arg3[%c0_9, %c0_10, %c0_11] : memref<8x128x16xbf16, #tpu.memory_space<vmem>>, vector<1x128x16xbf16>
    %41 = vector.shape_cast %40 : vector<1x128x16xbf16> to vector<128x16xbf16>
    %cst = arith.constant dense<0.000000e+00> : vector<128x128xf32>
    %42 = tpu.matmul %41, %39, %cst {dimension_numbers = #tpu.dot_dimension_numbers<[1], [0], [0], [1], [0, 0, 1, 1], [], []>} : vector<128x16xbf16>, vector<16x128xbf16>, vector<128x128xf32> -> vector<128x128xf32>
    %c0_12 = arith.constant 0 : index
    %c0_13 = arith.constant 0 : index
    %43 = vector.load %arg7[%c0_12, %c0_13] : memref<1024x128xf32, #tpu.memory_space<vmem>>, vector<128x128xf32>
    tpu.vector_store %arg7[%c0_12, %c0_13], %42 {strides = array<i32>} : memref<1024x128xf32, #tpu.memory_space<vmem>>, vector<128x128xf32>,
    %c1 = arith.constant 1 : index
    %c0_14 = arith.constant 0 : index
    %c0_15 = arith.constant 0 : index
    %44 = vector.load %arg2[%c1, %c0_14, %c0_15] : memref<8x16x128xbf16, #tpu.memory_space<vmem>>, vector<1x16x128xbf16>
    %45 = vector.shape_cast %44 : vector<1x16x128xbf16> to vector<16x128xbf16>
    %c1_16 = arith.constant 1 : index
    %c0_17 = arith.constant 0 : index
    %c0_18 = arith.constant 0 : index
    %46 = vector.load %arg3[%c1_16, %c0_17, %c0_18] : memref<8x128x16xbf16, #tpu.memory_space<vmem>>, vector<1x128x16xbf16>
    %47 = vector.shape_cast %46 : vector<1x128x16xbf16> to vector<128x16xbf16>
    %cst_19 = arith.constant dense<0.000000e+00> : vector<128x128xf32>
    %48 = tpu.matmul %47, %45, %cst_19 {dimension_numbers = #tpu.dot_dimension_numbers<[1], [0], [0], [1], [0, 0, 1, 1], [], []>} : vector<128x16xbf16>, vector<16x128xbf16>, vector<128x128xf32> -> vector<128x128xf32>
    %c128 = arith.constant 128 : index
    %c0_20 = arith.constant 0 : index
    %49 = vector.load %arg7[%c128, %c0_20] : memref<1024x128xf32, #tpu.memory_space<vmem>>, vector<128x128xf32>
    tpu.vector_store %arg7[%c128, %c0_20], %48 {strides = array<i32>} : memref<1024x128xf32, #tpu.memory_space<vmem>>, vector<128x128xf32>,
    %c2 = arith.constant 2 : index
    %c0_21 = arith.constant 0 : index
    %c0_22 = arith.constant 0 : index
    %50 = vector.load %arg2[%c2, %c0_21, %c0_22] : memref<8x16x128xbf16, #tpu.memory_space<vmem>>, vector<1x16x128xbf16>
    %51 = vector.shape_cast %50 : vector<1x16x128xbf16> to vector<16x128xbf16>
    %c2_23 = arith.constant 2 : index
    %c0_24 = arith.constant 0 : index
    %c0_25 = arith.constant 0 : index
    %52 = vector.load %arg3[%c2_23, %c0_24, %c0_25] : memref<8x128x16xbf16, #tpu.memory_space<vmem>>, vector<1x128x16xbf16>
    %53 = vector.shape_cast %52 : vector<1x128x16xbf16> to vector<128x16xbf16>
    %cst_26 = arith.constant dense<0.000000e+00> : vector<128x128xf32>
    %54 = tpu.matmul %53, %51, %cst_26 {dimension_numbers = #tpu.dot_dimension_numbers<[1], [0], [0], [1], [0, 0, 1, 1], [], []>} : vector<128x16xbf16>, vector<16x128xbf16>, vector<128x128xf32> -> vector<128x128xf32>
    %c256 = arith.constant 256 : index
    %c0_27 = arith.constant 0 : index
    %55 = vector.load %arg7[%c256, %c0_27] : memref<1024x128xf32, #tpu.memory_space<vmem>>, vector<128x128xf32>
    tpu.vector_store %arg7[%c256, %c0_27], %54 {strides = array<i32>} : memref<1024x128xf32, #tpu.memory_space<vmem>>, vector<128x128xf32>,
    %c3 = arith.constant 3 : index
    %c0_28 = arith.constant 0 : index
    %c0_29 = arith.constant 0 : index
    %56 = vector.load %arg2[%c3, %c0_28, %c0_29] : memref<8x16x128xbf16, #tpu.memory_space<vmem>>, vector<1x16x128xbf16>
    %57 = vector.shape_cast %56 : vector<1x16x128xbf16> to vector<16x128xbf16>
    %c3_30 = arith.constant 3 : index
    %c0_31 = arith.constant 0 : index
    %c0_32 = arith.constant 0 : index
    %58 = vector.load %arg3[%c3_30, %c0_31, %c0_32] : memref<8x128x16xbf16, #tpu.memory_space<vmem>>, vector<1x128x16xbf16>
    %59 = vector.shape_cast %58 : vector<1x128x16xbf16> to vector<128x16xbf16>
    %cst_33 = arith.constant dense<0.000000e+00> : vector<128x128xf32>
    %60 = tpu.matmul %59, %57, %cst_33 {dimension_numbers = #tpu.dot_dimension_numbers<[1], [0], [0], [1], [0, 0, 1, 1], [], []>} : vector<128x16xbf16>, vector<16x128xbf16>, vector<128x128xf32> -> vector<128x128xf32>
    %c384 = arith.constant 384 : index
    %c0_34 = arith.constant 0 : index
    %61 = vector.load %arg7[%c384, %c0_34] : memref<1024x128xf32, #tpu.memory_space<vmem>>, vector<128x128xf32>
    tpu.vector_store %arg7[%c384, %c0_34], %60 {strides = array<i32>} : memref<1024x128xf32, #tpu.memory_space<vmem>>, vector<128x128xf32>,
    %c4 = arith.constant 4 : index
    %c0_35 = arith.constant 0 : index
    %c0_36 = arith.constant 0 : index
    %62 = vector.load %arg2[%c4, %c0_35, %c0_36] : memref<8x16x128xbf16, #tpu.memory_space<vmem>>, vector<1x16x128xbf16>
    %63 = vector.shape_cast %62 : vector<1x16x128xbf16> to vector<16x128xbf16>
    %c4_37 = arith.constant 4 : index
    %c0_38 = arith.constant 0 : index
    %c0_39 = arith.constant 0 : index
    %64 = vector.load %arg3[%c4_37, %c0_38, %c0_39] : memref<8x128x16xbf16, #tpu.memory_space<vmem>>, vector<1x128x16xbf16>
    %65 = vector.shape_cast %64 : vector<1x128x16xbf16> to vector<128x16xbf16>
    %cst_40 = arith.constant dense<0.000000e+00> : vector<128x128xf32>
    %66 = tpu.matmul %65, %63, %cst_40 {dimension_numbers = #tpu.dot_dimension_numbers<[1], [0], [0], [1], [0, 0, 1, 1], [], []>} : vector<128x16xbf16>, vector<16x128xbf16>, vector<128x128xf32> -> vector<128x128xf32>
    %c512 = arith.constant 512 : index
    %c0_41 = arith.constant 0 : index
    %67 = vector.load %arg7[%c512, %c0_41] : memref<1024x128xf32, #tpu.memory_space<vmem>>, vector<128x128xf32>
    tpu.vector_store %arg7[%c512, %c0_41], %66 {strides = array<i32>} : memref<1024x128xf32, #tpu.memory_space<vmem>>, vector<128x128xf32>,
    %c5 = arith.constant 5 : index
    %c0_42 = arith.constant 0 : index
    %c0_43 = arith.constant 0 : index
    %68 = vector.load %arg2[%c5, %c0_42, %c0_43] : memref<8x16x128xbf16, #tpu.memory_space<vmem>>, vector<1x16x128xbf16>
    %69 = vector.shape_cast %68 : vector<1x16x128xbf16> to vector<16x128xbf16>
    %c5_44 = arith.constant 5 : index
    %c0_45 = arith.constant 0 : index
    %c0_46 = arith.constant 0 : index
    %70 = vector.load %arg3[%c5_44, %c0_45, %c0_46] : memref<8x128x16xbf16, #tpu.memory_space<vmem>>, vector<1x128x16xbf16>
    %71 = vector.shape_cast %70 : vector<1x128x16xbf16> to vector<128x16xbf16>
    %cst_47 = arith.constant dense<0.000000e+00> : vector<128x128xf32>
    %72 = tpu.matmul %71, %69, %cst_47 {dimension_numbers = #tpu.dot_dimension_numbers<[1], [0], [0], [1], [0, 0, 1, 1], [], []>} : vector<128x16xbf16>, vector<16x128xbf16>, vector<128x128xf32> -> vector<128x128xf32>
    %c640 = arith.constant 640 : index
    %c0_48 = arith.constant 0 : index
    %73 = vector.load %arg7[%c640, %c0_48] : memref<1024x128xf32, #tpu.memory_space<vmem>>, vector<128x128xf32>
    tpu.vector_store %arg7[%c640, %c0_48], %72 {strides = array<i32>} : memref<1024x128xf32, #tpu.memory_space<vmem>>, vector<128x128xf32>,
    %c6 = arith.constant 6 : index
    %c0_49 = arith.constant 0 : index
    %c0_50 = arith.constant 0 : index
    %74 = vector.load %arg2[%c6, %c0_49, %c0_50] : memref<8x16x128xbf16, #tpu.memory_space<vmem>>, vector<1x16x128xbf16>
    %75 = vector.shape_cast %74 : vector<1x16x128xbf16> to vector<16x128xbf16>
    %c6_51 = arith.constant 6 : index
    %c0_52 = arith.constant 0 : index
    %c0_53 = arith.constant 0 : index
    %76 = vector.load %arg3[%c6_51, %c0_52, %c0_53] : memref<8x128x16xbf16, #tpu.memory_space<vmem>>, vector<1x128x16xbf16>
    %77 = vector.shape_cast %76 : vector<1x128x16xbf16> to vector<128x16xbf16>
    %cst_54 = arith.constant dense<0.000000e+00> : vector<128x128xf32>
    %78 = tpu.matmul %77, %75, %cst_54 {dimension_numbers = #tpu.dot_dimension_numbers<[1], [0], [0], [1], [0, 0, 1, 1], [], []>} : vector<128x16xbf16>, vector<16x128xbf16>, vector<128x128xf32> -> vector<128x128xf32>
    %c768 = arith.constant 768 : index
    %c0_55 = arith.constant 0 : index
    %79 = vector.load %arg7[%c768, %c0_55] : memref<1024x128xf32, #tpu.memory_space<vmem>>, vector<128x128xf32>
    tpu.vector_store %arg7[%c768, %c0_55], %78 {strides = array<i32>} : memref<1024x128xf32, #tpu.memory_space<vmem>>, vector<128x128xf32>,
    %c7 = arith.constant 7 : index
    %c0_56 = arith.constant 0 : index
    %c0_57 = arith.constant 0 : index
    %80 = vector.load %arg2[%c7, %c0_56, %c0_57] : memref<8x16x128xbf16, #tpu.memory_space<vmem>>, vector<1x16x128xbf16>
    %81 = vector.shape_cast %80 : vector<1x16x128xbf16> to vector<16x128xbf16>
    %c7_58 = arith.constant 7 : index
    %c0_59 = arith.constant 0 : index
    %c0_60 = arith.constant 0 : index
    %82 = vector.load %arg3[%c7_58, %c0_59, %c0_60] : memref<8x128x16xbf16, #tpu.memory_space<vmem>>, vector<1x128x16xbf16>
    %83 = vector.shape_cast %82 : vector<1x128x16xbf16> to vector<128x16xbf16>
    %cst_61 = arith.constant dense<0.000000e+00> : vector<128x128xf32>
    %84 = tpu.matmul %83, %81, %cst_61 {dimension_numbers = #tpu.dot_dimension_numbers<[1], [0], [0], [1], [0, 0, 1, 1], [], []>} : vector<128x16xbf16>, vector<16x128xbf16>, vector<128x128xf32> -> vector<128x128xf32>
    %c896 = arith.constant 896 : index
    %c0_62 = arith.constant 0 : index
    %85 = vector.load %arg7[%c896, %c0_62] : memref<1024x128xf32, #tpu.memory_space<vmem>>, vector<128x128xf32>
    tpu.vector_store %arg7[%c896, %c0_62], %84 {strides = array<i32>} : memref<1024x128xf32, #tpu.memory_space<vmem>>, vector<128x128xf32>,
    %86 = tpu.iota {dimensions = array<i32: 1>} : vector<1x128xi32>
    %87 = tpu.iota {dimensions = array<i32: 1>} : vector<1x128xi32>
    %88 = tpu.iota {dimensions = array<i32: 0>} : vector<8x1xi32>
    %cst_63 = arith.constant 0.000000e+00 : f32
    %89 = vector.broadcast %cst_63 : f32 to vector<8x128xf32>
    %c0_64 = arith.constant 0 : index
    %c0_65 = arith.constant 0 : index
    %c0_66 = arith.constant 0 : index
    %90 = vector.load %arg8[%c0_64, %c0_65, %c0_66] : memref<128x8x128xf32, #tpu.memory_space<vmem>>, vector<1x8x128xf32>
    %91 = vector.shape_cast %90 : vector<1x8x128xf32> to vector<8x128xf32>
    %92 = vector.shape_cast %89 : vector<8x128xf32> to vector<1x8x128xf32>
    tpu.vector_store %arg8[%c0_64, %c0_65, %c0_66], %92 {strides = array<i32>} : memref<128x8x128xf32, #tpu.memory_space<vmem>>, vector<1x8x128xf32>,
    %cst_67 = arith.constant 0.000000e+00 : f32
    %93 = vector.broadcast %cst_67 : f32 to vector<8x128xf32>
    %c0_68 = arith.constant 0 : index
    %c0_69 = arith.constant 0 : index
    %94 = vector.load %arg7[%c0_68, %c0_69] : memref<1024x128xf32, #tpu.memory_space<vmem>>, vector<1x128xf32>
    %c0_i32 = arith.constant 0 : i32
    %95 = vector.broadcast %c0_i32 : i32 to vector<8x1xi32>
    %96 = arith.cmpi eq, %88, %95 : vector<8x1xi32>
    %97 = vector.shape_cast %96 : vector<8x1xi1> to vector<8x1xi1>
    %98 = vector.broadcast %97 : vector<8x1xi1> to vector<8x128xi1>
    %99 = vector.shape_cast %94 : vector<1x128xf32> to vector<1x128xf32>
    %100 = vector.broadcast %99 : vector<1x128xf32> to vector<8x128xf32>
    %101 = arith.select %98, %100, %93 : vector<8x128xi1>, vector<8x128xf32>
    %c128_70 = arith.constant 128 : index
    %c0_71 = arith.constant 0 : index
    %102 = vector.load %arg7[%c128_70, %c0_71] : memref<1024x128xf32, #tpu.memory_space<vmem>>, vector<1x128xf32>
    %c1_i32_72 = arith.constant 1 : i32
    %103 = vector.broadcast %c1_i32_72 : i32 to vector<8x1xi32>
    %104 = arith.cmpi eq, %88, %103 : vector<8x1xi32>
    %105 = vector.shape_cast %104 : vector<8x1xi1> to vector<8x1xi1>
    %106 = vector.broadcast %105 : vector<8x1xi1> to vector<8x128xi1>
    %107 = vector.shape_cast %102 : vector<1x128xf32> to vector<1x128xf32>
    %108 = vector.broadcast %107 : vector<1x128xf32> to vector<8x128xf32>
    %109 = arith.select %106, %108, %101 : vector<8x128xi1>, vector<8x128xf32>
    %c256_73 = arith.constant 256 : index
    %c0_74 = arith.constant 0 : index
    %110 = vector.load %arg7[%c256_73, %c0_74] : memref<1024x128xf32, #tpu.memory_space<vmem>>, vector<1x128xf32>
    %c2_i32_75 = arith.constant 2 : i32
    %111 = vector.broadcast %c2_i32_75 : i32 to vector<8x1xi32>
    %112 = arith.cmpi eq, %88, %111 : vector<8x1xi32>
    %113 = vector.shape_cast %112 : vector<8x1xi1> to vector<8x1xi1>
    %114 = vector.broadcast %113 : vector<8x1xi1> to vector<8x128xi1>
    %115 = vector.shape_cast %110 : vector<1x128xf32> to vector<1x128xf32>
    %116 = vector.broadcast %115 : vector<1x128xf32> to vector<8x128xf32>
    %117 = arith.select %114, %116, %109 : vector<8x128xi1>, vector<8x128xf32>
    %c384_76 = arith.constant 384 : index
    %c0_77 = arith.constant 0 : index
    %118 = vector.load %arg7[%c384_76, %c0_77] : memref<1024x128xf32, #tpu.memory_space<vmem>>, vector<1x128xf32>
    %c3_i32_78 = arith.constant 3 : i32
    %119 = vector.broadcast %c3_i32_78 : i32 to vector<8x1xi32>
    %120 = arith.cmpi eq, %88, %119 : vector<8x1xi32>
    %121 = vector.shape_cast %120 : vector<8x1xi1> to vector<8x1xi1>
    %122 = vector.broadcast %121 : vector<8x1xi1> to vector<8x128xi1>
    %123 = vector.shape_cast %118 : vector<1x128xf32> to vector<1x128xf32>
    %124 = vector.broadcast %123 : vector<1x128xf32> to vector<8x128xf32>
    %125 = arith.select %122, %124, %117 : vector<8x128xi1>, vector<8x128xf32>
    %c512_79 = arith.constant 512 : index
    %c0_80 = arith.constant 0 : index
    %126 = vector.load %arg7[%c512_79, %c0_80] : memref<1024x128xf32, #tpu.memory_space<vmem>>, vector<1x128xf32>
    %c4_i32_81 = arith.constant 4 : i32
    %127 = vector.broadcast %c4_i32_81 : i32 to vector<8x1xi32>
    %128 = arith.cmpi eq, %88, %127 : vector<8x1xi32>
    %129 = vector.shape_cast %128 : vector<8x1xi1> to vector<8x1xi1>
    %130 = vector.broadcast %129 : vector<8x1xi1> to vector<8x128xi1>
    %131 = vector.shape_cast %126 : vector<1x128xf32> to vector<1x128xf32>
    %132 = vector.broadcast %131 : vector<1x128xf32> to vector<8x128xf32>
    %133 = arith.select %130, %132, %125 : vector<8x128xi1>, vector<8x128xf32>
    %c640_82 = arith.constant 640 : index
    %c0_83 = arith.constant 0 : index
    %134 = vector.load %arg7[%c640_82, %c0_83] : memref<1024x128xf32, #tpu.memory_space<vmem>>, vector<1x128xf32>
    %c5_i32_84 = arith.constant 5 : i32
    %135 = vector.broadcast %c5_i32_84 : i32 to vector<8x1xi32>
    %136 = arith.cmpi eq, %88, %135 : vector<8x1xi32>
    %137 = vector.shape_cast %136 : vector<8x1xi1> to vector<8x1xi1>
    %138 = vector.broadcast %137 : vector<8x1xi1> to vector<8x128xi1>
    %139 = vector.shape_cast %134 : vector<1x128xf32> to vector<1x128xf32>
    %140 = vector.broadcast %139 : vector<1x128xf32> to vector<8x128xf32>
    %141 = arith.select %138, %140, %133 : vector<8x128xi1>, vector<8x128xf32>
    %c768_85 = arith.constant 768 : index
    %c0_86 = arith.constant 0 : index
    %142 = vector.load %arg7[%c768_85, %c0_86] : memref<1024x128xf32, #tpu.memory_space<vmem>>, vector<1x128xf32>
    %c6_i32_87 = arith.constant 6 : i32
    %143 = vector.broadcast %c6_i32_87 : i32 to vector<8x1xi32>
    %144 = arith.cmpi eq, %88, %143 : vector<8x1xi32>
    %145 = vector.shape_cast %144 : vector<8x1xi1> to vector<8x1xi1>
    %146 = vector.broadcast %145 : vector<8x1xi1> to vector<8x128xi1>
    %147 = vector.shape_cast %142 : vector<1x128xf32> to vector<1x128xf32>
    %148 = vector.broadcast %147 : vector<1x128xf32> to vector<8x128xf32>
    %149 = arith.select %146, %148, %141 : vector<8x128xi1>, vector<8x128xf32>
    %c896_88 = arith.constant 896 : index
    %c0_89 = arith.constant 0 : index
    %150 = vector.load %arg7[%c896_88, %c0_89] : memref<1024x128xf32, #tpu.memory_space<vmem>>, vector<1x128xf32>
    %c7_i32_90 = arith.constant 7 : i32
    %151 = vector.broadcast %c7_i32_90 : i32 to vector<8x1xi32>
    %152 = arith.cmpi eq, %88, %151 : vector<8x1xi32>
    %153 = vector.shape_cast %152 : vector<8x1xi1> to vector<8x1xi1>
    %154 = vector.broadcast %153 : vector<8x1xi1> to vector<8x128xi1>
    %155 = vector.shape_cast %150 : vector<1x128xf32> to vector<1x128xf32>
    %156 = vector.broadcast %155 : vector<1x128xf32> to vector<8x128xf32>
    %157 = arith.select %154, %156, %149 : vector<8x128xi1>, vector<8x128xf32>
    %c1_i32_91 = arith.constant 1 : i32
    %158 = arith.subi %37, %c1_i32_91 : i32
    %159 = arith.addi %c1_i32_91, %158 : i32
    %c1_i32_92 = arith.constant 1 : i32
    %160 = scf.for %arg9 = %c1_i32_91 to %159 step %c1_i32_92 iter_args(%arg10 = %157) -> (vector<8x128xf32>)  : i32 {
      %c1_i32_132 = arith.constant 1 : i32
      %250 = tpu.dynamic_rotate %arg10 by %c1_i32_132 dim 1 : vector<8x128xf32>, i32 -> vector<8x128xf32>
      %251 = arith.cmpf olt, %arg10, %250 : vector<8x128xf32>
      %252 = arith.extui %251 : vector<8x128xi1> to vector<8x128xi32>
      %253 = arith.sitofp %252 : vector<8x128xi32> to vector<8x128xf32>
      %254 = arith.index_cast %arg9 : i32 to index
      %c0_133 = arith.constant 0 : index
      %c0_134 = arith.constant 0 : index
      %255 = vector.load %arg8[%254, %c0_133, %c0_134] : memref<128x8x128xf32, #tpu.memory_space<vmem>>, vector<1x8x128xf32>
      %256 = vector.shape_cast %255 : vector<1x8x128xf32> to vector<8x128xf32>
      %257 = vector.shape_cast %253 : vector<8x128xf32> to vector<1x8x128xf32>
      tpu.vector_store %arg8[%254, %c0_133, %c0_134], %257 {strides = array<i32>} : memref<128x8x128xf32, #tpu.memory_space<vmem>>, vector<1x8x128xf32>,
      %c0_i32_135 = arith.constant 0 : i32
      %258 = vector.broadcast %c0_i32_135 : i32 to vector<1x128xi32>
      %259 = arith.cmpi eq, %86, %258 : vector<1x128xi32>
      %cst_136 = arith.constant -1.000000e+30 : f32
      %260 = vector.shape_cast %259 : vector<1x128xi1> to vector<1x128xi1>
      %261 = vector.broadcast %260 : vector<1x128xi1> to vector<8x128xi1>
      %262 = vector.broadcast %cst_136 : f32 to vector<8x128xf32>
      %263 = arith.select %261, %262, %250 : vector<8x128xi1>, vector<8x128xf32>
      %264 = vector.broadcast %arg9 : i32 to vector<1x128xi32>
      %265 = arith.cmpi eq, %86, %264 : vector<1x128xi32>
      %cst_137 = arith.constant -1.000000e+30 : f32
      %266 = vector.shape_cast %265 : vector<1x128xi1> to vector<1x128xi1>
      %267 = vector.broadcast %266 : vector<1x128xi1> to vector<8x128xi1>
      %268 = vector.broadcast %cst_137 : f32 to vector<8x128xf32>
      %269 = arith.select %267, %268, %arg10 : vector<8x128xi1>, vector<8x128xf32>
      %cst_138 = arith.constant 0.000000e+00 : f32
      %270 = vector.broadcast %cst_138 : f32 to vector<8x128xf32>
      %c0_i32_139 = arith.constant 0 : i32
      %271 = arith.addi %c0_i32_139, %arg9 : i32
      %272 = arith.index_cast %271 : i32 to index
      %c0_140 = arith.constant 0 : index
      %273 = vector.load %arg7[%272, %c0_140] : memref<1024x128xf32, #tpu.memory_space<vmem>>, vector<1x128xf32>
      %c0_i32_141 = arith.constant 0 : i32
      %274 = vector.broadcast %c0_i32_141 : i32 to vector<8x1xi32>
      %275 = arith.cmpi eq, %88, %274 : vector<8x1xi32>
      %276 = vector.shape_cast %275 : vector<8x1xi1> to vector<8x1xi1>
      %277 = vector.broadcast %276 : vector<8x1xi1> to vector<8x128xi1>
      %278 = vector.shape_cast %273 : vector<1x128xf32> to vector<1x128xf32>
      %279 = vector.broadcast %278 : vector<1x128xf32> to vector<8x128xf32>
      %280 = arith.select %277, %279, %270 : vector<8x128xi1>, vector<8x128xf32>
      %c128_i32 = arith.constant 128 : i32
      %281 = arith.addi %c128_i32, %arg9 : i32
      %282 = arith.index_cast %281 : i32 to index
      %c0_142 = arith.constant 0 : index
      %283 = vector.load %arg7[%282, %c0_142] : memref<1024x128xf32, #tpu.memory_space<vmem>>, vector<1x128xf32>
      %c1_i32_143 = arith.constant 1 : i32
      %284 = vector.broadcast %c1_i32_143 : i32 to vector<8x1xi32>
      %285 = arith.cmpi eq, %88, %284 : vector<8x1xi32>
      %286 = vector.shape_cast %285 : vector<8x1xi1> to vector<8x1xi1>
      %287 = vector.broadcast %286 : vector<8x1xi1> to vector<8x128xi1>
      %288 = vector.shape_cast %283 : vector<1x128xf32> to vector<1x128xf32>
      %289 = vector.broadcast %288 : vector<1x128xf32> to vector<8x128xf32>
      %290 = arith.select %287, %289, %280 : vector<8x128xi1>, vector<8x128xf32>
      %c256_i32 = arith.constant 256 : i32
      %291 = arith.addi %c256_i32, %arg9 : i32
      %292 = arith.index_cast %291 : i32 to index
      %c0_144 = arith.constant 0 : index
      %293 = vector.load %arg7[%292, %c0_144] : memref<1024x128xf32, #tpu.memory_space<vmem>>, vector<1x128xf32>
      %c2_i32_145 = arith.constant 2 : i32
      %294 = vector.broadcast %c2_i32_145 : i32 to vector<8x1xi32>
      %295 = arith.cmpi eq, %88, %294 : vector<8x1xi32>
      %296 = vector.shape_cast %295 : vector<8x1xi1> to vector<8x1xi1>
      %297 = vector.broadcast %296 : vector<8x1xi1> to vector<8x128xi1>
      %298 = vector.shape_cast %293 : vector<1x128xf32> to vector<1x128xf32>
      %299 = vector.broadcast %298 : vector<1x128xf32> to vector<8x128xf32>
      %300 = arith.select %297, %299, %290 : vector<8x128xi1>, vector<8x128xf32>
      %c384_i32 = arith.constant 384 : i32
      %301 = arith.addi %c384_i32, %arg9 : i32
      %302 = arith.index_cast %301 : i32 to index
      %c0_146 = arith.constant 0 : index
      %303 = vector.load %arg7[%302, %c0_146] : memref<1024x128xf32, #tpu.memory_space<vmem>>, vector<1x128xf32>
      %c3_i32_147 = arith.constant 3 : i32
      %304 = vector.broadcast %c3_i32_147 : i32 to vector<8x1xi32>
      %305 = arith.cmpi eq, %88, %304 : vector<8x1xi32>
      %306 = vector.shape_cast %305 : vector<8x1xi1> to vector<8x1xi1>
      %307 = vector.broadcast %306 : vector<8x1xi1> to vector<8x128xi1>
      %308 = vector.shape_cast %303 : vector<1x128xf32> to vector<1x128xf32>
      %309 = vector.broadcast %308 : vector<1x128xf32> to vector<8x128xf32>
      %310 = arith.select %307, %309, %300 : vector<8x128xi1>, vector<8x128xf32>
      %c512_i32 = arith.constant 512 : i32
      %311 = arith.addi %c512_i32, %arg9 : i32
      %312 = arith.index_cast %311 : i32 to index
      %c0_148 = arith.constant 0 : index
      %313 = vector.load %arg7[%312, %c0_148] : memref<1024x128xf32, #tpu.memory_space<vmem>>, vector<1x128xf32>
      %c4_i32_149 = arith.constant 4 : i32
      %314 = vector.broadcast %c4_i32_149 : i32 to vector<8x1xi32>
      %315 = arith.cmpi eq, %88, %314 : vector<8x1xi32>
      %316 = vector.shape_cast %315 : vector<8x1xi1> to vector<8x1xi1>
      %317 = vector.broadcast %316 : vector<8x1xi1> to vector<8x128xi1>
      %318 = vector.shape_cast %313 : vector<1x128xf32> to vector<1x128xf32>
      %319 = vector.broadcast %318 : vector<1x128xf32> to vector<8x128xf32>
      %320 = arith.select %317, %319, %310 : vector<8x128xi1>, vector<8x128xf32>
      %c640_i32 = arith.constant 640 : i32
      %321 = arith.addi %c640_i32, %arg9 : i32
      %322 = arith.index_cast %321 : i32 to index
      %c0_150 = arith.constant 0 : index
      %323 = vector.load %arg7[%322, %c0_150] : memref<1024x128xf32, #tpu.memory_space<vmem>>, vector<1x128xf32>
      %c5_i32_151 = arith.constant 5 : i32
      %324 = vector.broadcast %c5_i32_151 : i32 to vector<8x1xi32>
      %325 = arith.cmpi eq, %88, %324 : vector<8x1xi32>
      %326 = vector.shape_cast %325 : vector<8x1xi1> to vector<8x1xi1>
      %327 = vector.broadcast %326 : vector<8x1xi1> to vector<8x128xi1>
      %328 = vector.shape_cast %323 : vector<1x128xf32> to vector<1x128xf32>
      %329 = vector.broadcast %328 : vector<1x128xf32> to vector<8x128xf32>
      %330 = arith.select %327, %329, %320 : vector<8x128xi1>, vector<8x128xf32>
      %c768_i32 = arith.constant 768 : i32
      %331 = arith.addi %c768_i32, %arg9 : i32
      %332 = arith.index_cast %331 : i32 to index
      %c0_152 = arith.constant 0 : index
      %333 = vector.load %arg7[%332, %c0_152] : memref<1024x128xf32, #tpu.memory_space<vmem>>, vector<1x128xf32>
      %c6_i32_153 = arith.constant 6 : i32
      %334 = vector.broadcast %c6_i32_153 : i32 to vector<8x1xi32>
      %335 = arith.cmpi eq, %88, %334 : vector<8x1xi32>
      %336 = vector.shape_cast %335 : vector<8x1xi1> to vector<8x1xi1>
      %337 = vector.broadcast %336 : vector<8x1xi1> to vector<8x128xi1>
      %338 = vector.shape_cast %333 : vector<1x128xf32> to vector<1x128xf32>
      %339 = vector.broadcast %338 : vector<1x128xf32> to vector<8x128xf32>
      %340 = arith.select %337, %339, %330 : vector<8x128xi1>, vector<8x128xf32>
      %c896_i32 = arith.constant 896 : i32
      %341 = arith.addi %c896_i32, %arg9 : i32
      %342 = arith.index_cast %341 : i32 to index
      %c0_154 = arith.constant 0 : index
      %343 = vector.load %arg7[%342, %c0_154] : memref<1024x128xf32, #tpu.memory_space<vmem>>, vector<1x128xf32>
      %c7_i32_155 = arith.constant 7 : i32
      %344 = vector.broadcast %c7_i32_155 : i32 to vector<8x1xi32>
      %345 = arith.cmpi eq, %88, %344 : vector<8x1xi32>
      %346 = vector.shape_cast %345 : vector<8x1xi1> to vector<8x1xi1>
      %347 = vector.broadcast %346 : vector<8x1xi1> to vector<8x128xi1>
      %348 = vector.shape_cast %343 : vector<1x128xf32> to vector<1x128xf32>
      %349 = vector.broadcast %348 : vector<1x128xf32> to vector<8x128xf32>
      %350 = arith.select %347, %349, %340 : vector<8x128xi1>, vector<8x128xf32>
      %351 = arith.maximumf %269, %263 : vector<8x128xf32>
      %352 = arith.addf %350, %351 : vector<8x128xf32>
      scf.yield %352 : vector<8x128xf32>
    }
    %c0_93 = arith.constant 0 : index
    %c0_94 = arith.constant 0 : index
    %161 = vector.load %arg4[%c0_93, %c0_94] : memref<8x1xi32, #tpu.memory_space<vmem>>, vector<8x1xi32>
    %c0_95 = arith.constant 0 : index
    %c0_96 = arith.constant 0 : index
    %162 = vector.load %arg5[%c0_95, %c0_96] : memref<8x1xi32, #tpu.memory_space<vmem>>, vector<8x1xi32>
    %c1_i32_97 = arith.constant 1 : i32
    %163 = vector.broadcast %c1_i32_97 : i32 to vector<8x1xi32>
    %164 = arith.subi %161, %163 : vector<8x1xi32>
    %c-1_i32 = arith.constant -1 : i32
    %165 = vector.broadcast %c-1_i32 : i32 to vector<8x128xi32>
    %c0_i32_98 = arith.constant 0 : i32
    %166 = arith.subi %37, %c0_i32_98 : i32
    %167 = arith.addi %c0_i32_98, %166 : i32
    %c1_i32_99 = arith.constant 1 : i32
    %168:2 = scf.for %arg9 = %c0_i32_98 to %167 step %c1_i32_99 iter_args(%arg10 = %164, %arg11 = %165) -> (vector<8x1xi32>, vector<8x128xi32>)  : i32 {
      %c1_i32_132 = arith.constant 1 : i32
      %250 = arith.subi %37, %c1_i32_132 : i32
      %251 = arith.subi %250, %arg9 : i32
      %252 = vector.broadcast %251 : i32 to vector<8x1xi32>
      %253 = arith.cmpi slt, %252, %162 : vector<8x1xi32>
      %c-1_i32_133 = arith.constant -1 : i32
      %254 = vector.broadcast %c-1_i32_133 : i32 to vector<8x1xi32>
      %255 = arith.select %253, %arg10, %254 : vector<8x1xi1>, vector<8x1xi32>
      %256 = vector.broadcast %251 : i32 to vector<1x128xi32>
      %257 = arith.cmpi eq, %87, %256 : vector<1x128xi32>
      %258 = vector.shape_cast %257 : vector<1x128xi1> to vector<1x128xi1>
      %259 = vector.broadcast %258 : vector<1x128xi1> to vector<8x128xi1>
      %260 = vector.shape_cast %255 : vector<8x1xi32> to vector<8x1xi32>
      %261 = vector.broadcast %260 : vector<8x1xi32> to vector<8x128xi32>
      %262 = arith.select %259, %261, %arg11 : vector<8x128xi1>, vector<8x128xi32>
      %263 = arith.index_cast %251 : i32 to index
      %c0_134 = arith.constant 0 : index
      %c0_135 = arith.constant 0 : index
      %264 = vector.load %arg8[%263, %c0_134, %c0_135] : memref<128x8x128xf32, #tpu.memory_space<vmem>>, vector<1x8x128xf32>
      %265 = vector.shape_cast %264 : vector<1x8x128xf32> to vector<8x128xf32>
      %266 = vector.broadcast %86 : vector<1x128xi32> to vector<8x128xi32>
      %267 = vector.broadcast %arg10 : vector<8x1xi32> to vector<8x128xi32>
      %268 = arith.cmpi eq, %266, %267 : vector<8x128xi32>
      %cst_136 = arith.constant 0.000000e+00 : f32
      %269 = vector.broadcast %cst_136 : f32 to vector<8x128xf32>
      %270 = arith.select %268, %265, %269 : vector<8x128xi1>, vector<8x128xf32>
      %cst_137 = arith.constant dense<0.000000e+00> : vector<8xf32>
      %271 = vector.multi_reduction <add>, %270, %cst_137 [1] : vector<8x128xf32> to vector<8xf32>
      %272 = vector.shape_cast %271 : vector<8xf32> to vector<8x1xf32>
      %c0_i32_138 = arith.constant 0 : i32
      %273 = vector.broadcast %c0_i32_138 : i32 to vector<8x1xi32>
      %274 = arith.cmpi ne, %arg10, %273 : vector<8x1xi32>
      %275 = arith.andi %253, %274 : vector<8x1xi1>
      %276 = vector.broadcast %251 : i32 to vector<8x1xi32>
      %277 = arith.cmpi eq, %arg10, %276 : vector<8x1xi32>
      %cst_139 = arith.constant 0.000000e+00 : f32
      %278 = vector.broadcast %cst_139 : f32 to vector<8x1xf32>
      %279 = arith.cmpf ogt, %272, %278 : vector<8x1xf32>
      %280 = arith.ori %277, %279 : vector<8x1xi1>
      %281 = arith.andi %275, %280 : vector<8x1xi1>
      %282 = arith.extui %281 : vector<8x1xi1> to vector<8x1xi32>
      %283 = arith.subi %arg10, %282 : vector<8x1xi32>
      scf.yield %283, %262 : vector<8x1xi32>, vector<8x128xi32>
    }
    %169 = tpu.iota {dimensions = array<i32: 0>} : vector<128x128xi32>
    %170 = vector.extract_strided_slice %168#1 {offsets = [0, 0], sizes = [1, 128], strides = [1, 1]} : vector<8x128xi32> to vector<1x128xi32>
    %c0_i32_100 = arith.constant 0 : i32
    %171 = vector.broadcast %c0_i32_100 : i32 to vector<128x128xi32>
    %172 = arith.addi %169, %171 : vector<128x128xi32>
    %173 = vector.broadcast %170 : vector<1x128xi32> to vector<128x128xi32>
    %174 = arith.cmpi eq, %172, %173 : vector<128x128xi32>
    %175 = arith.extui %174 : vector<128x128xi1> to vector<128x128xi32>
    %176 = arith.sitofp %175 : vector<128x128xi32> to vector<128x128xf32>
    %c0_101 = arith.constant 0 : index
    %c0_102 = arith.constant 0 : index
    %c0_103 = arith.constant 0 : index
    %177 = vector.load %arg6[%c0_101, %c0_102, %c0_103] : memref<8x128x128xf32, #tpu.memory_space<vmem>>, vector<1x128x128xf32>
    %178 = vector.shape_cast %177 : vector<1x128x128xf32> to vector<128x128xf32>
    %179 = vector.shape_cast %176 : vector<128x128xf32> to vector<1x128x128xf32>
    tpu.vector_store %arg6[%c0_101, %c0_102, %c0_103], %179 {strides = array<i32>} : memref<8x128x128xf32, #tpu.memory_space<vmem>>, vector<1x128x128xf32>,
    %180 = vector.extract_strided_slice %168#1 {offsets = [1, 0], sizes = [1, 128], strides = [1, 1]} : vector<8x128xi32> to vector<1x128xi32>
    %c0_i32_104 = arith.constant 0 : i32
    %181 = vector.broadcast %c0_i32_104 : i32 to vector<128x128xi32>
    %182 = arith.addi %169, %181 : vector<128x128xi32>
    %183 = vector.broadcast %180 : vector<1x128xi32> to vector<128x128xi32>
    %184 = arith.cmpi eq, %182, %183 : vector<128x128xi32>
    %185 = arith.extui %184 : vector<128x128xi1> to vector<128x128xi32>
    %186 = arith.sitofp %185 : vector<128x128xi32> to vector<128x128xf32>
    %c1_105 = arith.constant 1 : index
    %c0_106 = arith.constant 0 : index
    %c0_107 = arith.constant 0 : index
    %187 = vector.load %arg6[%c1_105, %c0_106, %c0_107] : memref<8x128x128xf32, #tpu.memory_space<vmem>>, vector<1x128x128xf32>
    %188 = vector.shape_cast %187 : vector<1x128x128xf32> to vector<128x128xf32>
    %189 = vector.shape_cast %186 : vector<128x128xf32> to vector<1x128x128xf32>
    tpu.vector_store %arg6[%c1_105, %c0_106, %c0_107], %189 {strides = array<i32>} : memref<8x128x128xf32, #tpu.memory_space<vmem>>, vector<1x128x128xf32>,
    %190 = vector.extract_strided_slice %168#1 {offsets = [2, 0], sizes = [1, 128], strides = [1, 1]} : vector<8x128xi32> to vector<1x128xi32>
    %c0_i32_108 = arith.constant 0 : i32
    %191 = vector.broadcast %c0_i32_108 : i32 to vector<128x128xi32>
    %192 = arith.addi %169, %191 : vector<128x128xi32>
    %193 = vector.broadcast %190 : vector<1x128xi32> to vector<128x128xi32>
    %194 = arith.cmpi eq, %192, %193 : vector<128x128xi32>
    %195 = arith.extui %194 : vector<128x128xi1> to vector<128x128xi32>
    %196 = arith.sitofp %195 : vector<128x128xi32> to vector<128x128xf32>
    %c2_109 = arith.constant 2 : index
    %c0_110 = arith.constant 0 : index
    %c0_111 = arith.constant 0 : index
    %197 = vector.load %arg6[%c2_109, %c0_110, %c0_111] : memref<8x128x128xf32, #tpu.memory_space<vmem>>, vector<1x128x128xf32>
    %198 = vector.shape_cast %197 : vector<1x128x128xf32> to vector<128x128xf32>
    %199 = vector.shape_cast %196 : vector<128x128xf32> to vector<1x128x128xf32>
    tpu.vector_store %arg6[%c2_109, %c0_110, %c0_111], %199 {strides = array<i32>} : memref<8x128x128xf32, #tpu.memory_space<vmem>>, vector<1x128x128xf32>,
    %200 = vector.extract_strided_slice %168#1 {offsets = [3, 0], sizes = [1, 128], strides = [1, 1]} : vector<8x128xi32> to vector<1x128xi32>
    %c0_i32_112 = arith.constant 0 : i32
    %201 = vector.broadcast %c0_i32_112 : i32 to vector<128x128xi32>
    %202 = arith.addi %169, %201 : vector<128x128xi32>
    %203 = vector.broadcast %200 : vector<1x128xi32> to vector<128x128xi32>
    %204 = arith.cmpi eq, %202, %203 : vector<128x128xi32>
    %205 = arith.extui %204 : vector<128x128xi1> to vector<128x128xi32>
    %206 = arith.sitofp %205 : vector<128x128xi32> to vector<128x128xf32>
    %c3_113 = arith.constant 3 : index
    %c0_114 = arith.constant 0 : index
    %c0_115 = arith.constant 0 : index
    %207 = vector.load %arg6[%c3_113, %c0_114, %c0_115] : memref<8x128x128xf32, #tpu.memory_space<vmem>>, vector<1x128x128xf32>
    %208 = vector.shape_cast %207 : vector<1x128x128xf32> to vector<128x128xf32>
    %209 = vector.shape_cast %206 : vector<128x128xf32> to vector<1x128x128xf32>
    tpu.vector_store %arg6[%c3_113, %c0_114, %c0_115], %209 {strides = array<i32>} : memref<8x128x128xf32, #tpu.memory_space<vmem>>, vector<1x128x128xf32>,
    %210 = vector.extract_strided_slice %168#1 {offsets = [4, 0], sizes = [1, 128], strides = [1, 1]} : vector<8x128xi32> to vector<1x128xi32>
    %c0_i32_116 = arith.constant 0 : i32
    %211 = vector.broadcast %c0_i32_116 : i32 to vector<128x128xi32>
    %212 = arith.addi %169, %211 : vector<128x128xi32>
    %213 = vector.broadcast %210 : vector<1x128xi32> to vector<128x128xi32>
    %214 = arith.cmpi eq, %212, %213 : vector<128x128xi32>
    %215 = arith.extui %214 : vector<128x128xi1> to vector<128x128xi32>
    %216 = arith.sitofp %215 : vector<128x128xi32> to vector<128x128xf32>
    %c4_117 = arith.constant 4 : index
    %c0_118 = arith.constant 0 : index
    %c0_119 = arith.constant 0 : index
    %217 = vector.load %arg6[%c4_117, %c0_118, %c0_119] : memref<8x128x128xf32, #tpu.memory_space<vmem>>, vector<1x128x128xf32>
    %218 = vector.shape_cast %217 : vector<1x128x128xf32> to vector<128x128xf32>
    %219 = vector.shape_cast %216 : vector<128x128xf32> to vector<1x128x128xf32>
    tpu.vector_store %arg6[%c4_117, %c0_118, %c0_119], %219 {strides = array<i32>} : memref<8x128x128xf32, #tpu.memory_space<vmem>>, vector<1x128x128xf32>,
    %220 = vector.extract_strided_slice %168#1 {offsets = [5, 0], sizes = [1, 128], strides = [1, 1]} : vector<8x128xi32> to vector<1x128xi32>
    %c0_i32_120 = arith.constant 0 : i32
    %221 = vector.broadcast %c0_i32_120 : i32 to vector<128x128xi32>
    %222 = arith.addi %169, %221 : vector<128x128xi32>
    %223 = vector.broadcast %220 : vector<1x128xi32> to vector<128x128xi32>
    %224 = arith.cmpi eq, %222, %223 : vector<128x128xi32>
    %225 = arith.extui %224 : vector<128x128xi1> to vector<128x128xi32>
    %226 = arith.sitofp %225 : vector<128x128xi32> to vector<128x128xf32>
    %c5_121 = arith.constant 5 : index
    %c0_122 = arith.constant 0 : index
    %c0_123 = arith.constant 0 : index
    %227 = vector.load %arg6[%c5_121, %c0_122, %c0_123] : memref<8x128x128xf32, #tpu.memory_space<vmem>>, vector<1x128x128xf32>
    %228 = vector.shape_cast %227 : vector<1x128x128xf32> to vector<128x128xf32>
    %229 = vector.shape_cast %226 : vector<128x128xf32> to vector<1x128x128xf32>
    tpu.vector_store %arg6[%c5_121, %c0_122, %c0_123], %229 {strides = array<i32>} : memref<8x128x128xf32, #tpu.memory_space<vmem>>, vector<1x128x128xf32>,
    %230 = vector.extract_strided_slice %168#1 {offsets = [6, 0], sizes = [1, 128], strides = [1, 1]} : vector<8x128xi32> to vector<1x128xi32>
    %c0_i32_124 = arith.constant 0 : i32
    %231 = vector.broadcast %c0_i32_124 : i32 to vector<128x128xi32>
    %232 = arith.addi %169, %231 : vector<128x128xi32>
    %233 = vector.broadcast %230 : vector<1x128xi32> to vector<128x128xi32>
    %234 = arith.cmpi eq, %232, %233 : vector<128x128xi32>
    %235 = arith.extui %234 : vector<128x128xi1> to vector<128x128xi32>
    %236 = arith.sitofp %235 : vector<128x128xi32> to vector<128x128xf32>
    %c6_125 = arith.constant 6 : index
    %c0_126 = arith.constant 0 : index
    %c0_127 = arith.constant 0 : index
    %237 = vector.load %arg6[%c6_125, %c0_126, %c0_127] : memref<8x128x128xf32, #tpu.memory_space<vmem>>, vector<1x128x128xf32>
    %238 = vector.shape_cast %237 : vector<1x128x128xf32> to vector<128x128xf32>
    %239 = vector.shape_cast %236 : vector<128x128xf32> to vector<1x128x128xf32>
    tpu.vector_store %arg6[%c6_125, %c0_126, %c0_127], %239 {strides = array<i32>} : memref<8x128x128xf32, #tpu.memory_space<vmem>>, vector<1x128x128xf32>,
    %240 = vector.extract_strided_slice %168#1 {offsets = [7, 0], sizes = [1, 128], strides = [1, 1]} : vector<8x128xi32> to vector<1x128xi32>
    %c0_i32_128 = arith.constant 0 : i32
    %241 = vector.broadcast %c0_i32_128 : i32 to vector<128x128xi32>
    %242 = arith.addi %169, %241 : vector<128x128xi32>
    %243 = vector.broadcast %240 : vector<1x128xi32> to vector<128x128xi32>
    %244 = arith.cmpi eq, %242, %243 : vector<128x128xi32>
    %245 = arith.extui %244 : vector<128x128xi1> to vector<128x128xi32>
    %246 = arith.sitofp %245 : vector<128x128xi32> to vector<128x128xf32>
    %c7_129 = arith.constant 7 : index
    %c0_130 = arith.constant 0 : index
    %c0_131 = arith.constant 0 : index
    %247 = vector.load %arg6[%c7_129, %c0_130, %c0_131] : memref<8x128x128xf32, #tpu.memory_space<vmem>>, vector<1x128x128xf32>
    %248 = vector.shape_cast %247 : vector<1x128x128xf32> to vector<128x128xf32>
    %249 = vector.shape_cast %246 : vector<128x128xf32> to vector<1x128x128xf32>
    tpu.vector_store %arg6[%c7_129, %c0_130, %c0_131], %249 {strides = array<i32>} : memref<8x128x128xf32, #tpu.memory_space<vmem>>, vector<1x128x128xf32>,
    return
  }
  func.func @transform_0(%arg0: i32, %arg1: memref<8xi32, #tpu.memory_space<smem>>) -> (i32, i32, i32) {
    %c0_i32 = arith.constant 0 : i32
    %c0_i32_0 = arith.constant 0 : i32
    %c0_i32_1 = arith.constant 0 : i32
    return %arg0, %c0_i32, %c0_i32_0 : i32, i32, i32
  }
  func.func @transform_1(%arg0: i32, %arg1: memref<8xi32, #tpu.memory_space<smem>>) -> (i32, i32, i32) {
    %c0_i32 = arith.constant 0 : i32
    %c0_i32_0 = arith.constant 0 : i32
    %c0_i32_1 = arith.constant 0 : i32
    return %arg0, %c0_i32, %c0_i32_0 : i32, i32, i32
  }
  func.func @transform_2(%arg0: i32, %arg1: memref<8xi32, #tpu.memory_space<smem>>) -> (i32, i32) {
    %c0_i32 = arith.constant 0 : i32
    %c0_i32_0 = arith.constant 0 : i32
    return %arg0, %c0_i32 : i32, i32
  }
  func.func @transform_3(%arg0: i32, %arg1: memref<8xi32, #tpu.memory_space<smem>>) -> (i32, i32) {
    %c0_i32 = arith.constant 0 : i32
    %c0_i32_0 = arith.constant 0 : i32
    return %arg0, %c0_i32 : i32, i32
  }
  func.func @transform_4(%arg0: i32, %arg1: memref<8xi32, #tpu.memory_space<smem>>) -> (i32, i32, i32) {
    %c0_i32 = arith.constant 0 : i32
    %c0_i32_0 = arith.constant 0 : i32
    %c0_i32_1 = arith.constant 0 : i32
    return %arg0, %c0_i32, %c0_i32_0 : i32, i32, i32
  }
}

</mosaic_0001>

<bundles_post_ra>
// kernel: tpu_custom_call.1
= control target key start
LH: loop header
LB: loop body
LE: loop exit
PB: predicated region body
PF: predicated region fallthrough
CT: control target
= control target key end

     0   :  { %s4211_s0 = inlined_call_operand.vmem [shape: s32[8], index: 0, kind: input, shape index: {}]   ;;  %s4212_s1 = inlined_call_operand.vmem [shape: bf16[8,16,128], index: 1, kind: input, shape index: {}]   ;;  %s4213_s2 = inlined_call_operand.vmem [shape: bf16[8,128,16], index: 2, kind: input, shape index: {}]   ;;  %s4214_s3 = inlined_call_operand.vmem [shape: s32[8,1], index: 3, kind: input, shape index: {}]   ;;  %s4215_s4 = inlined_call_operand.vmem [shape: s32[8,1], index: 4, kind: input, shape index: {}]   ;;  %s4216_s5 = inlined_call_operand.hbm [shape: f32[8,128,128], index: 5, kind: output, shape index: {}]  }
   0x1   :  { %s10_s20 = sshll.u32 %s4211_s0, 4  ;;  %s11_s20 = int_to_ptr.vmem [resolvable:$true] %s10_s20 }
   0x2   :  { %s3279_s21 = scalar_lea.vmem %s11_s20, 16  ;;  %p3284_p1 = scmp.lt.s32.totalorder %s11_s20, %s11_s20 }
   0x3   :  { %p3280_p0 = scmp.ne.s32.totalorder %s11_s20, %s3279_s21  ;;  %p3285_p2 = scmp.lt.s32.totalorder %s3279_s21, %s3279_s21 }
   0x5   :  { %p3286_p3 = por %p3285_p2, %p3284_p1 }
   0x7   :  { %p3287_p4 = pnand %p3286_p3, %p3280_p0 }
   0x9   :  { %3290 = shalt.err (!%p3287_p4)  }
   0xa   :  { %s3365_s22 = smov [#allocation5]  }
   0xb   :  { %13 = dma.vmem_to_smem %s11_s20, 16, %s3365_s22, [#allocation4] }
   0xc   :  { %3337 = dma.done.wait [#allocation4], 16 }
   0xd   :  { %3338 = vsyncadd [#allocation4], 4294967280 }
   0xe   :  { %15 = sfence }
   0xf   :  { %16 = vsyncpa [#allocation7], 0  ;;  %s27_s23 = sld [smem:[#allocation5]]  ;;  %s2506_s24 = sld [smem:[#allocation5 + $0x1]]  ;;  %v3205_v0 = vld [vmem:[%s4212_s1] sm:$0xff]   ;;  %v3206_v1 = vld [vmem:[%s4212_s1 + $0x8] sm:$0xff]   ;;  %v1679_v57 = vlaneseq }
  0x10   :  { %s2507_s25 = sld [smem:[#allocation5 + $0x2]]  ;;  %s3406_s26 = sld [smem:[#allocation5 + $0x3]]  ;;  %3005 = vmatprep.subr.bf16.mxu0 %v3205_v0  ;;  %3023 = vmatprep.subr.bf16.mxu1 %v3206_v1  ;;  %v3207_v2 = vld [vmem:[%s4213_s2] sm:$0xff]   ;;  %vm120_vm0 = vcmask 130048   ;;  %v3209_v4 = vld [vmem:[%s4213_s2 + $0x8] sm:$0xff]   ;;  %v3211_v6 = vld [vmem:[%s4212_s1 + $0x10] sm:$0xff]  }
  0x11   :  { %s3408_s0 = sld [smem:[#allocation5 + $0x4]]  ;;  %s3410_s27 = sld [smem:[#allocation5 + $0x5]]  ;;  %3006 = vmatpush3.bf16.msra.mxu0 %v3205_v0  ;;  %3024 = vmatpush3.bf16.msra.mxu1 %v3206_v1  ;;  %v3208_v3 = vld [vmem:[%s4213_s2 + $0x40] sm:$0xff]   ;;  %v3210_v5 = vld [vmem:[%s4213_s2 + $0x48] sm:$0xff]   ;;  %v3212_v7 = vld [vmem:[%s4212_s1 + $0x18] sm:$0xff]   ;;  %v3641_v59 = vand.u32 127, %v1679_v57 }
  0x12   :  { %3007 = vmatprep.mubr.msk.bf16.mxu0 %vm120_vm0, %v3207_v2  ;;  %3025 = vmatprep.mubr.msk.bf16.mxu1 %vm120_vm0, %v3208_v3  ;;  %v3213_v8 = vld [vmem:[%s4213_s2 + $0x10] sm:$0xff]   ;;  %v3215_v10 = vld [vmem:[%s4213_s2 + $0x18] sm:$0xff]   ;;  %v3217_v12 = vld [vmem:[%s4213_s2 + $0x20] sm:$0xff]   ;;  %s2511_s9 = sld [smem:[#allocation5 + $0x6]]  ;;  %s2512_s10 = sld [smem:[#allocation5 + $0x7]] }
  0x13   :  { %3041 = vmatprep.subr.bf16.mxu0 %v3211_v6  ;;  %3059 = vmatprep.subr.bf16.mxu1 %v3212_v7  ;;  %v3214_v9 = vld [vmem:[%s4213_s2 + $0x50] sm:$0xff]   ;;  %v3216_v11 = vld [vmem:[%s4213_s2 + $0x58] sm:$0xff]   ;;  %v3218_v13 = vld [vmem:[%s4213_s2 + $0x60] sm:$0xff]  }
  0x14   :  { %3008 = vmatmul.mubr.msk.bf16.vlgmr.msra.gmra.mrb[0].mxu0 %vm120_vm0, %v3209_v4  ;;  %3026 = vmatmul.mubr.msk.bf16.vlgmr.msra.gmra.mrb[0].mxu1 %vm120_vm0, %v3210_v5  ;;  %v3219_v14 = vld [vmem:[%s4213_s2 + $0x28] sm:$0xff]   ;;  %v3221_v16 = vld [vmem:[%s4213_s2 + $0x30] sm:$0xff]   ;;  %v3223_v18 = vld [vmem:[%s4213_s2 + $0x38] sm:$0xff]  }
  0x15   :  { %p30_p5 = scmp.gt.s32.totalorder %s27_s23, %s2506_s24  ;;  %3042 = vmatpush3.bf16.msra.mxu0 %v3211_v6  ;;  %3060 = vmatpush3.bf16.msra.mxu1 %v3212_v7  ;;  %v3220_v15 = vld [vmem:[%s4213_s2 + $0x68] sm:$0xff]   ;;  %v3222_v17 = vld [vmem:[%s4213_s2 + $0x70] sm:$0xff]   ;;  %v3229_v19 = vld [vmem:[%s4212_s1 + $0x20] sm:$0xff]  }
  0x16   :  { %3011 = vmatprep.mubr.msk.bf16.mxu0 %vm120_vm0, %v3213_v8  ;;  %3029 = vmatprep.mubr.msk.bf16.mxu1 %vm120_vm0, %v3214_v9  ;;  %v3230_v20 = vld [vmem:[%s4212_s1 + $0x28] sm:$0xff]   ;;  %v3224_v21 = vld [vmem:[%s4213_s2 + $0x78] sm:$0xff]   ;;  %v3225_v22 = vld [vmem:[%s4213_s2 + $0x80] sm:$0xff]  }
  0x17   :  { %s4218_s23 = smov (!%p30_p5, %s27_s23), %s2506_s24  ;;  %3077 = vmatprep.subr.bf16.mxu0 %v3229_v19  ;;  %3095 = vmatprep.subr.bf16.mxu1 %v3230_v20  ;;  %v3226_v23 = vld [vmem:[%s4213_s2 + $0xc0] sm:$0xff]   ;;  %v3227_v24 = vld [vmem:[%s4213_s2 + $0x88] sm:$0xff]   ;;  %v3231_v26 = vld [vmem:[%s4213_s2 + $0x90] sm:$0xff]  }
  0x18   :  { %p34_p6 = scmp.gt.s32.totalorder %s4218_s23, %s2507_s25  ;;  %v3228_v25 = vld [vmem:[%s4213_s2 + $0xc8] sm:$0xff]   ;;  %v3232_v27 = vld [vmem:[%s4213_s2 + $0xd0] sm:$0xff]   ;;  %v3233_v28 = vld [vmem:[%s4213_s2 + $0x98] sm:$0xff]  }
  0x19   :  { %v3234_v29 = vld [vmem:[%s4213_s2 + $0xd8] sm:$0xff]   ;;  %v3235_v30 = vld [vmem:[%s4213_s2 + $0xa0] sm:$0xff]   ;;  %v3247_v31 = vld [vmem:[%s4212_s1 + $0x30] sm:$0xff]  }
  0x1a   :  { %s4220_s23 = smov (!%p34_p6, %s4218_s23), %s2507_s25  ;;  %v3248_v32 = vld [vmem:[%s4212_s1 + $0x38] sm:$0xff]   ;;  %v3236_v33 = vld [vmem:[%s4213_s2 + $0xe0] sm:$0xff]   ;;  %v3237_v34 = vld [vmem:[%s4213_s2 + $0xa8] sm:$0xff]  }
  0x1b   :  { %p38_p7 = scmp.gt.s32.totalorder %s4220_s23, %s3406_s26  ;;  %v3238_v35 = vld [vmem:[%s4213_s2 + $0xe8] sm:$0xff]   ;;  %v3239_v36 = vld [vmem:[%s4213_s2 + $0xb0] sm:$0xff]   ;;  %v3241_v38 = vld [vmem:[%s4213_s2 + $0xb8] sm:$0xff]  }
  0x1c   :  { %3012 = vmatmul.mubr.msk.bf16.gmra.mrb[4].mxu0 %vm120_vm0, %v3215_v10  ;;  %3030 = vmatmul.mubr.msk.bf16.gmra.mrb[4].mxu1 %vm120_vm0, %v3216_v11  ;;  %v3240_v37 = vld [vmem:[%s4213_s2 + $0xf0] sm:$0xff]   ;;  %v3242_v39 = vld [vmem:[%s4213_s2 + $0xf8] sm:$0xff]   ;;  %v3243_v40 = vld [vmem:[%s4213_s2 + $0x100] sm:$0xff]   ;;  %v3366_v10 = vmov 0.0  }
  0x1d   :  { %s4222_s23 = smov (!%p38_p7, %s4220_s23), %s3406_s26  ;;  %3015 = vmatprep.mubr.msk.bf16.mxu0 %vm120_vm0, %v3217_v12  ;;  %3033 = vmatprep.mubr.msk.bf16.mxu1 %vm120_vm0, %v3218_v13  ;;  %v3244_v41 = vld [vmem:[%s4213_s2 + $0x140] sm:$0xff]   ;;  %v3245_v42 = vld [vmem:[%s4213_s2 + $0x108] sm:$0xff]   ;;  %v3249_v44 = vld [vmem:[%s4213_s2 + $0x110] sm:$0xff]   ;;  %1683 = vst [vmem:[#allocation3] sm:$0xff] %v3366_v10 }
  0x1e   :  { %p42_p8 = scmp.gt.s32.totalorder %s4222_s23, %s3408_s0  ;;  %v3246_v43 = vld [vmem:[%s4213_s2 + $0x148] sm:$0xff]   ;;  %v3250_v45 = vld [vmem:[%s4213_s2 + $0x150] sm:$0xff]   ;;  %v3251_v46 = vld [vmem:[%s4213_s2 + $0x118] sm:$0xff]  }
  0x1f   :  { %v3252_v47 = vld [vmem:[%s4213_s2 + $0x158] sm:$0xff]   ;;  %v3253_v48 = vld [vmem:[%s4213_s2 + $0x120] sm:$0xff]   ;;  %v3255_v50 = vld [vmem:[%s4213_s2 + $0x128] sm:$0xff]  }
  0x20   :  { %s4224_s23 = smov (!%p42_p8, %s4222_s23), %s3408_s0  ;;  %v3254_v49 = vld [vmem:[%s4213_s2 + $0x160] sm:$0xff]   ;;  %v3256_v51 = vld [vmem:[%s4213_s2 + $0x168] sm:$0xff]   ;;  %v3257_v52 = vld [vmem:[%s4213_s2 + $0x130] sm:$0xff]  }
  0x21   :  { %p46_p9 = scmp.gt.s32.totalorder %s4224_s23, %s3410_s27  ;;  %v3258_v53 = vld [vmem:[%s4213_s2 + $0x170] sm:$0xff]   ;;  %v3259_v54 = vld [vmem:[%s4213_s2 + $0x138] sm:$0xff]   ;;  %v3261_v56 = vld [vmem:[%s4213_s2 + $0x180] sm:$0xff]  }
  0x22   :  { %v3260_v55 = vld [vmem:[%s4213_s2 + $0x178] sm:$0xff]   ;;  %v3262_v58 = vld [vmem:[%s4213_s2 + $0x1c0] sm:$0xff]   ;;  %v3263_v60 = vld [vmem:[%s4213_s2 + $0x188] sm:$0xff]  }
  0x23   :  { %s4226_s23 = smov (!%p46_p9, %s4224_s23), %s3410_s27  ;;  %v3264_v61 = vld [vmem:[%s4213_s2 + $0x1c8] sm:$0xff]   ;;  %v3265_v62 = vld [vmem:[%s4213_s2 + $0x190] sm:$0xff]   ;;  %v3267_v0 = vld [vmem:[%s4213_s2 + $0x198] sm:$0xff]  }
  0x24   :  { %3016 = vmatmul.mubr.msk.bf16.gmra.mrb[8].mxu0 %vm120_vm0, %v3219_v14  ;;  %p50_p10 = scmp.gt.s32.totalorder %s4226_s23, %s2511_s9  ;;  %3034 = vmatmul.mubr.msk.bf16.gmra.mrb[8].mxu1 %vm120_vm0, %v3220_v15  ;;  %v3266_v63 = vld [vmem:[%s4213_s2 + $0x1d0] sm:$0xff]   ;;  %v3268_v1 = vld [vmem:[%s4213_s2 + $0x1d8] sm:$0xff]   ;;  %v3269_v2 = vld [vmem:[%s4213_s2 + $0x1a0] sm:$0xff]  }
  0x25   :  { %3019 = vmatprep.mubr.msk.bf16.mxu0 %vm120_vm0, %v3221_v16  ;;  %3037 = vmatprep.mubr.msk.bf16.mxu1 %vm120_vm0, %v3222_v17  ;;  %v3270_v3 = vld [vmem:[%s4213_s2 + $0x1e0] sm:$0xff]   ;;  %v3271_v4 = vld [vmem:[%s4213_s2 + $0x1a8] sm:$0xff]   ;;  %v3273_v6 = vld [vmem:[%s4213_s2 + $0x1b0] sm:$0xff]  }
  0x26   :  { %s4228_s23 = smov (!%p50_p10, %s4226_s23), %s2511_s9  ;;  %v3272_v5 = vld [vmem:[%s4213_s2 + $0x1e8] sm:$0xff]   ;;  %v3274_v7 = vld [vmem:[%s4213_s2 + $0x1f0] sm:$0xff]   ;;  %v3275_v8 = vld [vmem:[%s4213_s2 + $0x1b8] sm:$0xff]  }
  0x27   :  { %p54_p11 = scmp.gt.s32.totalorder %s4228_s23, %s2512_s10  ;;  %v3276_v9 = vld [vmem:[%s4213_s2 + $0x1f8] sm:$0xff]  }
  0x29   :  { %s4230_s23 = smov (!%p54_p11, %s4228_s23), %s2512_s10 }
  0x2a   :  { %p2783_p12 = scmp.le.s32.totalorder %s4230_s23, 1 }
  0x2b   :  { %s3732_s2 = smov (!%p2783_p12), 1  }
  0x2c   :  { %3020 = vmatmul.mubr.msk.bf16.gmra.mrb[12].mxu0 %vm120_vm0, %v3223_v18  ;;  %3038 = vmatmul.mubr.msk.bf16.gmra.mrb[12].mxu1 %vm120_vm0, %v3224_v21 }
  0x2d   :  { %3043 = vmatprep.mubr.msk.bf16.mxu0 %vm120_vm0, %v3225_v22  ;;  %3061 = vmatprep.mubr.msk.bf16.mxu1 %vm120_vm0, %v3226_v23 }
  0x34   :  { %3044 = vmatmul.mubr.msk.bf16.vlgmr.msra.gmra.mrb[16].mxu0 %vm120_vm0, %v3227_v24  ;;  %3062 = vmatmul.mubr.msk.bf16.vlgmr.msra.gmra.mrb[16].mxu1 %vm120_vm0, %v3228_v25 }
  0x35   :  { %3078 = vmatpush3.bf16.msra.mxu0 %v3229_v19  ;;  %3096 = vmatpush3.bf16.msra.mxu1 %v3230_v20 }
  0x36   :  { %3047 = vmatprep.mubr.msk.bf16.mxu0 %vm120_vm0, %v3231_v26  ;;  %3065 = vmatprep.mubr.msk.bf16.mxu1 %vm120_vm0, %v3232_v27 }
  0x37   :  { %3113 = vmatprep.subr.bf16.mxu0 %v3247_v31  ;;  %3131 = vmatprep.subr.bf16.mxu1 %v3248_v32 }
  0x3c   :  { %3048 = vmatmul.mubr.msk.bf16.gmra.mrb[20].mxu0 %vm120_vm0, %v3233_v28  ;;  %3066 = vmatmul.mubr.msk.bf16.gmra.mrb[20].mxu1 %vm120_vm0, %v3234_v29 }
  0x3d   :  { %3051 = vmatprep.mubr.msk.bf16.mxu0 %vm120_vm0, %v3235_v30  ;;  %3069 = vmatprep.mubr.msk.bf16.mxu1 %vm120_vm0, %v3236_v33 }
  0x44   :  { %3052 = vmatmul.mubr.msk.bf16.gmra.mrb[24].mxu0 %vm120_vm0, %v3237_v34  ;;  %3070 = vmatmul.mubr.msk.bf16.gmra.mrb[24].mxu1 %vm120_vm0, %v3238_v35 }
  0x45   :  { %3055 = vmatprep.mubr.msk.bf16.mxu0 %vm120_vm0, %v3239_v36  ;;  %3073 = vmatprep.mubr.msk.bf16.mxu1 %vm120_vm0, %v3240_v37 }
  0x4c   :  { %3056 = vmatmul.mubr.msk.bf16.gmra.mrb[28].mxu0 %vm120_vm0, %v3241_v38  ;;  %3074 = vmatmul.mubr.msk.bf16.gmra.mrb[28].mxu1 %vm120_vm0, %v3242_v39 }
  0x4d   :  { %3079 = vmatprep.mubr.msk.bf16.mxu0 %vm120_vm0, %v3243_v40  ;;  %3097 = vmatprep.mubr.msk.bf16.mxu1 %vm120_vm0, %v3244_v41 }
  0x54   :  { %3080 = vmatmul.mubr.msk.bf16.vlgmr.msra.gmra.mrb[32].mxu0 %vm120_vm0, %v3245_v42  ;;  %3098 = vmatmul.mubr.msk.bf16.vlgmr.msra.gmra.mrb[32].mxu1 %vm120_vm0, %v3246_v43 }
  0x55   :  { %3114 = vmatpush3.bf16.msra.mxu0 %v3247_v31  ;;  %3132 = vmatpush3.bf16.msra.mxu1 %v3248_v32 }
  0x56   :  { %3083 = vmatprep.mubr.msk.bf16.mxu0 %vm120_vm0, %v3249_v44  ;;  %3101 = vmatprep.mubr.msk.bf16.mxu1 %vm120_vm0, %v3250_v45 }
  0x5c   :  { %3084 = vmatmul.mubr.msk.bf16.gmra.mrb[36].mxu0 %vm120_vm0, %v3251_v46  ;;  %3102 = vmatmul.mubr.msk.bf16.gmra.mrb[36].mxu1 %vm120_vm0, %v3252_v47 }
  0x5d   :  { %3087 = vmatprep.mubr.msk.bf16.mxu0 %vm120_vm0, %v3253_v48  ;;  %3105 = vmatprep.mubr.msk.bf16.mxu1 %vm120_vm0, %v3254_v49 }
  0x64   :  { %3088 = vmatmul.mubr.msk.bf16.gmra.mrb[40].mxu0 %vm120_vm0, %v3255_v50  ;;  %3106 = vmatmul.mubr.msk.bf16.gmra.mrb[40].mxu1 %vm120_vm0, %v3256_v51 }
  0x65   :  { %3091 = vmatprep.mubr.msk.bf16.mxu0 %vm120_vm0, %v3257_v52  ;;  %3109 = vmatprep.mubr.msk.bf16.mxu1 %vm120_vm0, %v3258_v53 }
  0x6c   :  { %3092 = vmatmul.mubr.msk.bf16.gmra.mrb[44].mxu0 %vm120_vm0, %v3259_v54  ;;  %3110 = vmatmul.mubr.msk.bf16.gmra.mrb[44].mxu1 %vm120_vm0, %v3260_v55 }
  0x6d   :  { %3115 = vmatprep.mubr.msk.bf16.mxu0 %vm120_vm0, %v3261_v56  ;;  %3133 = vmatprep.mubr.msk.bf16.mxu1 %vm120_vm0, %v3262_v58 }
  0x74   :  { %3116 = vmatmul.mubr.msk.bf16.vlgmr.msra.gmra.mrb[48].mxu0 %vm120_vm0, %v3263_v60  ;;  %3134 = vmatmul.mubr.msk.bf16.vlgmr.msra.gmra.mrb[48].mxu1 %vm120_vm0, %v3264_v61 }
  0x75   :  { %3119 = vmatprep.mubr.msk.bf16.mxu0 %vm120_vm0, %v3265_v62  ;;  %3137 = vmatprep.mubr.msk.bf16.mxu1 %vm120_vm0, %v3266_v63 }
  0x7c   :  { %3120 = vmatmul.mubr.msk.bf16.gmra.mrb[52].mxu0 %vm120_vm0, %v3267_v0  ;;  %3138 = vmatmul.mubr.msk.bf16.gmra.mrb[52].mxu1 %vm120_vm0, %v3268_v1 }
  0x7d   :  { %3123 = vmatprep.mubr.msk.bf16.mxu0 %vm120_vm0, %v3269_v2  ;;  %3141 = vmatprep.mubr.msk.bf16.mxu1 %vm120_vm0, %v3270_v3 }
  0x84   :  { %3124 = vmatmul.mubr.msk.bf16.gmra.mrb[56].mxu0 %vm120_vm0, %v3271_v4  ;;  %3142 = vmatmul.mubr.msk.bf16.gmra.mrb[56].mxu1 %vm120_vm0, %v3272_v5 }
  0x85   :  { %3127 = vmatprep.mubr.msk.bf16.mxu0 %vm120_vm0, %v3273_v6  ;;  %3145 = vmatprep.mubr.msk.bf16.mxu1 %vm120_vm0, %v3274_v7 }
  0x8c   :  { %3128 = vmatmul.mubr.msk.bf16.gmra.mrb[60].mxu0 %vm120_vm0, %v3275_v8  ;;  %3146 = vmatmul.mubr.msk.bf16.gmra.mrb[60].mxu1 %vm120_vm0, %v3276_v9 }
  0xe7   :  { %v3009_v11 = vpop.f32.mrb[0].mxu0  ;;  %v3027_v12 = vpop.f32.mrb[0].mxu1 }
  0xe8   :  { %244 = vst [vmem:[#allocation2 + $0x10] sm:$0xff] %v3009_v11  ;;  %v179_v13 = vpop.f32.mrb[1].mxu0  ;;  %447 = vst [vmem:[#allocation2 + $0x90] sm:$0xff] %v3027_v12  ;;  %v382_v14 = vpop.f32.mrb[1].mxu1 }
  0xe9   :  { %242 = vst [vmem:[#allocation2] sm:$0xff] %v179_v13  ;;  %v3010_v15 = vpop.f32.mrb[2].mxu0  ;;  %445 = vst [vmem:[#allocation2 + $0x80] sm:$0xff] %v382_v14  ;;  %v3028_v16 = vpop.f32.mrb[2].mxu1 }
  0xea   :  { %245 = vst [vmem:[#allocation2 + $0x18] sm:$0xff] %v3010_v15  ;;  %v182_v17 = vpop.f32.mrb[3].mxu0  ;;  %448 = vst [vmem:[#allocation2 + $0x98] sm:$0xff] %v3028_v16  ;;  %v385_v18 = vpop.f32.mrb[3].mxu1 }
  0xeb   :  { %243 = vst [vmem:[#allocation2 + $0x8] sm:$0xff] %v182_v17  ;;  %446 = vst [vmem:[#allocation2 + $0x88] sm:$0xff] %v385_v18 }
  0xef   :  { %v3013_v19 = vpop.f32.mrb[4].mxu0  ;;  %v3031_v20 = vpop.f32.mrb[4].mxu1 }
  0xf0   :  { %248 = vst [vmem:[#allocation2 + $0x30] sm:$0xff] %v3013_v19  ;;  %v195_v21 = vpop.f32.mrb[5].mxu0  ;;  %451 = vst [vmem:[#allocation2 + $0xb0] sm:$0xff] %v3031_v20  ;;  %v398_v22 = vpop.f32.mrb[5].mxu1 }
  0xf1   :  { %246 = vst [vmem:[#allocation2 + $0x20] sm:$0xff] %v195_v21  ;;  %v3014_v23 = vpop.f32.mrb[6].mxu0  ;;  %449 = vst [vmem:[#allocation2 + $0xa0] sm:$0xff] %v398_v22  ;;  %v3032_v24 = vpop.f32.mrb[6].mxu1 }
  0xf2   :  { %249 = vst [vmem:[#allocation2 + $0x38] sm:$0xff] %v3014_v23  ;;  %v198_v25 = vpop.f32.mrb[7].mxu0  ;;  %452 = vst [vmem:[#allocation2 + $0xb8] sm:$0xff] %v3032_v24  ;;  %v401_v26 = vpop.f32.mrb[7].mxu1 }
  0xf3   :  { %247 = vst [vmem:[#allocation2 + $0x28] sm:$0xff] %v198_v25  ;;  %450 = vst [vmem:[#allocation2 + $0xa8] sm:$0xff] %v401_v26 }
  0xf7   :  { %v3017_v27 = vpop.f32.mrb[8].mxu0  ;;  %v3035_v28 = vpop.f32.mrb[8].mxu1 }
  0xf8   :  { %252 = vst [vmem:[#allocation2 + $0x50] sm:$0xff] %v3017_v27  ;;  %v211_v29 = vpop.f32.mrb[9].mxu0  ;;  %455 = vst [vmem:[#allocation2 + $0xd0] sm:$0xff] %v3035_v28  ;;  %v414_v30 = vpop.f32.mrb[9].mxu1 }
  0xf9   :  { %250 = vst [vmem:[#allocation2 + $0x40] sm:$0xff] %v211_v29  ;;  %v3018_v31 = vpop.f32.mrb[10].mxu0  ;;  %453 = vst [vmem:[#allocation2 + $0xc0] sm:$0xff] %v414_v30  ;;  %v3036_v32 = vpop.f32.mrb[10].mxu1 }
  0xfa   :  { %253 = vst [vmem:[#allocation2 + $0x58] sm:$0xff] %v3018_v31  ;;  %v214_v33 = vpop.f32.mrb[11].mxu0  ;;  %456 = vst [vmem:[#allocation2 + $0xd8] sm:$0xff] %v3036_v32  ;;  %v417_v34 = vpop.f32.mrb[11].mxu1 }
  0xfb   :  { %251 = vst [vmem:[#allocation2 + $0x48] sm:$0xff] %v214_v33  ;;  %454 = vst [vmem:[#allocation2 + $0xc8] sm:$0xff] %v417_v34 }
  0xff   :  { %v3021_v35 = vpop.f32.mrb[12].mxu0  ;;  %v3039_v36 = vpop.f32.mrb[12].mxu1 }
 0x100   :  { %256 = vst [vmem:[#allocation2 + $0x70] sm:$0xff] %v3021_v35  ;;  %v227_v37 = vpop.f32.mrb[13].mxu0  ;;  %459 = vst [vmem:[#allocation2 + $0xf0] sm:$0xff] %v3039_v36  ;;  %v430_v38 = vpop.f32.mrb[13].mxu1 }
 0x101   :  { %254 = vst [vmem:[#allocation2 + $0x60] sm:$0xff] %v227_v37  ;;  %v3022_v39 = vpop.f32.mrb[14].mxu0  ;;  %457 = vst [vmem:[#allocation2 + $0xe0] sm:$0xff] %v430_v38  ;;  %v3040_v40 = vpop.f32.mrb[14].mxu1  ;;  %v3705_v38 = vshrl.u32 %v1679_v57, 7 }
 0x102   :  { %257 = vst [vmem:[#allocation2 + $0x78] sm:$0xff] %v3022_v39  ;;  %v230_v41 = vpop.f32.mrb[15].mxu0  ;;  %460 = vst [vmem:[#allocation2 + $0xf8] sm:$0xff] %v3040_v40  ;;  %v433_v42 = vpop.f32.mrb[15].mxu1 }
 0x103   :  { %255 = vst [vmem:[#allocation2 + $0x68] sm:$0xff] %v230_v41  ;;  %458 = vst [vmem:[#allocation2 + $0xe8] sm:$0xff] %v433_v42  ;;  %vm1685_vm1 = vcmp.eq.s32.totalorder %v3705_v38, 0  ;;  %vm1694_vm2 = vcmp.eq.s32.totalorder %v3705_v38, 1  ;;  %vm1703_vm3 = vcmp.eq.s32.totalorder %v3705_v38, 2  ;;  %vm1712_vm4 = vcmp.eq.s32.totalorder %v3705_v38, 3 }
 0x104   :  { %vm1721_vm5 = vcmp.eq.s32.totalorder %v3705_v38, 4  ;;  %vm1730_vm6 = vcmp.eq.s32.totalorder %v3705_v38, 5  ;;  %vm1739_vm7 = vcmp.eq.s32.totalorder %v3705_v38, 6  ;;  %vm1748_vm8 = vcmp.eq.s32.totalorder %v3705_v38, 7 }
 0x107   :  { %v3045_v43 = vpop.f32.mrb[16].mxu0  ;;  %v3063_v44 = vpop.f32.mrb[16].mxu1 }
 0x108   :  { %650 = vst [vmem:[#allocation2 + $0x110] sm:$0xff] %v3045_v43  ;;  %v585_v45 = vpop.f32.mrb[17].mxu0  ;;  %853 = vst [vmem:[#allocation2 + $0x190] sm:$0xff] %v3063_v44  ;;  %v788_v46 = vpop.f32.mrb[17].mxu1  ;;  %v2775_v44 = vld [vmem:[#allocation2] ss:$0 sm:$0xff] }
 0x109   :  { %648 = vst [vmem:[#allocation2 + $0x100] sm:$0xff] %v585_v45  ;;  %v3046_v47 = vpop.f32.mrb[18].mxu0  ;;  %851 = vst [vmem:[#allocation2 + $0x180] sm:$0xff] %v788_v46  ;;  %v3064_v48 = vpop.f32.mrb[18].mxu1  ;;  %v1692_v57 = vsel %vm1685_vm1, %v2775_v44, 0.0 }
 0x10a   :  { %651 = vst [vmem:[#allocation2 + $0x118] sm:$0xff] %v3046_v47  ;;  %v588_v49 = vpop.f32.mrb[19].mxu0  ;;  %854 = vst [vmem:[#allocation2 + $0x198] sm:$0xff] %v3064_v48  ;;  %v791_v50 = vpop.f32.mrb[19].mxu1  ;;  %v2776_v48 = vld [vmem:[#allocation2 + $0x80] ss:$0 sm:$0xff] }
 0x10b   :  { %649 = vst [vmem:[#allocation2 + $0x108] sm:$0xff] %v588_v49  ;;  %852 = vst [vmem:[#allocation2 + $0x188] sm:$0xff] %v791_v50 }
 0x10f   :  { %v3049_v51 = vpop.f32.mrb[20].mxu0  ;;  %v3067_v52 = vpop.f32.mrb[20].mxu1 }
 0x110   :  { %654 = vst [vmem:[#allocation2 + $0x130] sm:$0xff] %v3049_v51  ;;  %v601_v53 = vpop.f32.mrb[21].mxu0  ;;  %857 = vst [vmem:[#allocation2 + $0x1b0] sm:$0xff] %v3067_v52  ;;  %v804_v54 = vpop.f32.mrb[21].mxu1  ;;  %v2777_v49 = vld [vmem:[#allocation2 + $0x100] ss:$0 sm:$0xff]  ;;  %v1701_v51 = vsel %vm1694_vm2, %v2776_v48, %v1692_v57 }
 0x111   :  { %652 = vst [vmem:[#allocation2 + $0x120] sm:$0xff] %v601_v53  ;;  %v3050_v55 = vpop.f32.mrb[22].mxu0  ;;  %855 = vst [vmem:[#allocation2 + $0x1a0] sm:$0xff] %v804_v54  ;;  %v3068_v56 = vpop.f32.mrb[22].mxu1  ;;  %v1710_v54 = vsel %vm1703_vm3, %v2777_v49, %v1701_v51 }
 0x112   :  { %655 = vst [vmem:[#allocation2 + $0x138] sm:$0xff] %v3050_v55  ;;  %v604_v58 = vpop.f32.mrb[23].mxu0  ;;  %858 = vst [vmem:[#allocation2 + $0x1b8] sm:$0xff] %v3068_v56  ;;  %v807_v60 = vpop.f32.mrb[23].mxu1  ;;  %v2778_v55 = vld [vmem:[#allocation2 + $0x180] ss:$0 sm:$0xff] }
 0x113   :  { %653 = vst [vmem:[#allocation2 + $0x128] sm:$0xff] %v604_v58  ;;  %856 = vst [vmem:[#allocation2 + $0x1a8] sm:$0xff] %v807_v60 }
 0x117   :  { %v3053_v61 = vpop.f32.mrb[24].mxu0  ;;  %v3071_v62 = vpop.f32.mrb[24].mxu1 }
 0x118   :  { %658 = vst [vmem:[#allocation2 + $0x150] sm:$0xff] %v3053_v61  ;;  %v617_v63 = vpop.f32.mrb[25].mxu0  ;;  %861 = vst [vmem:[#allocation2 + $0x1d0] sm:$0xff] %v3071_v62  ;;  %v820_v0 = vpop.f32.mrb[25].mxu1 }
 0x119   :  { %656 = vst [vmem:[#allocation2 + $0x140] sm:$0xff] %v617_v63  ;;  %v3054_v1 = vpop.f32.mrb[26].mxu0  ;;  %859 = vst [vmem:[#allocation2 + $0x1c0] sm:$0xff] %v820_v0  ;;  %v3072_v2 = vpop.f32.mrb[26].mxu1  ;;  %v1719_v0 = vsel %vm1712_vm4, %v2778_v55, %v1710_v54 }
 0x11a   :  { %659 = vst [vmem:[#allocation2 + $0x158] sm:$0xff] %v3054_v1  ;;  %v620_v3 = vpop.f32.mrb[27].mxu0  ;;  %862 = vst [vmem:[#allocation2 + $0x1d8] sm:$0xff] %v3072_v2  ;;  %v823_v4 = vpop.f32.mrb[27].mxu1 }
 0x11b   :  { %657 = vst [vmem:[#allocation2 + $0x148] sm:$0xff] %v620_v3  ;;  %860 = vst [vmem:[#allocation2 + $0x1c8] sm:$0xff] %v823_v4 }
 0x11f   :  { %v3057_v5 = vpop.f32.mrb[28].mxu0  ;;  %v3075_v6 = vpop.f32.mrb[28].mxu1 }
 0x120   :  { %662 = vst [vmem:[#allocation2 + $0x170] sm:$0xff] %v3057_v5  ;;  %v633_v7 = vpop.f32.mrb[29].mxu0  ;;  %865 = vst [vmem:[#allocation2 + $0x1f0] sm:$0xff] %v3075_v6  ;;  %v836_v8 = vpop.f32.mrb[29].mxu1 }
 0x121   :  { %660 = vst [vmem:[#allocation2 + $0x160] sm:$0xff] %v633_v7  ;;  %v3058_v9 = vpop.f32.mrb[30].mxu0  ;;  %863 = vst [vmem:[#allocation2 + $0x1e0] sm:$0xff] %v836_v8  ;;  %v3076_v11 = vpop.f32.mrb[30].mxu1 }
 0x122   :  { %663 = vst [vmem:[#allocation2 + $0x178] sm:$0xff] %v3058_v9  ;;  %v636_v12 = vpop.f32.mrb[31].mxu0  ;;  %866 = vst [vmem:[#allocation2 + $0x1f8] sm:$0xff] %v3076_v11  ;;  %v839_v13 = vpop.f32.mrb[31].mxu1 }
 0x123   :  { %661 = vst [vmem:[#allocation2 + $0x168] sm:$0xff] %v636_v12  ;;  %864 = vst [vmem:[#allocation2 + $0x1e8] sm:$0xff] %v839_v13 }
 0x127   :  { %v3081_v14 = vpop.f32.mrb[32].mxu0  ;;  %v3099_v15 = vpop.f32.mrb[32].mxu1 }
 0x128   :  { %1056 = vst [vmem:[#allocation2 + $0x210] sm:$0xff] %v3081_v14  ;;  %v991_v16 = vpop.f32.mrb[33].mxu0  ;;  %1259 = vst [vmem:[#allocation2 + $0x290] sm:$0xff] %v3099_v15  ;;  %v1194_v17 = vpop.f32.mrb[33].mxu1 }
 0x129   :  { %1054 = vst [vmem:[#allocation2 + $0x200] sm:$0xff] %v991_v16  ;;  %v3082_v18 = vpop.f32.mrb[34].mxu0  ;;  %1257 = vst [vmem:[#allocation2 + $0x280] sm:$0xff] %v1194_v17  ;;  %v3100_v19 = vpop.f32.mrb[34].mxu1 }
 0x12a   :  { %1057 = vst [vmem:[#allocation2 + $0x218] sm:$0xff] %v3082_v18  ;;  %v994_v20 = vpop.f32.mrb[35].mxu0  ;;  %1260 = vst [vmem:[#allocation2 + $0x298] sm:$0xff] %v3100_v19  ;;  %v1197_v21 = vpop.f32.mrb[35].mxu1 }
 0x12b   :  { %1055 = vst [vmem:[#allocation2 + $0x208] sm:$0xff] %v994_v20  ;;  %1258 = vst [vmem:[#allocation2 + $0x288] sm:$0xff] %v1197_v21 }
 0x12f   :  { %v3085_v22 = vpop.f32.mrb[36].mxu0  ;;  %v3103_v23 = vpop.f32.mrb[36].mxu1 }
 0x130   :  { %1060 = vst [vmem:[#allocation2 + $0x230] sm:$0xff] %v3085_v22  ;;  %v1007_v24 = vpop.f32.mrb[37].mxu0  ;;  %1263 = vst [vmem:[#allocation2 + $0x2b0] sm:$0xff] %v3103_v23  ;;  %v1210_v25 = vpop.f32.mrb[37].mxu1  ;;  %v2779_v60 = vld [vmem:[#allocation2 + $0x200] ss:$0 sm:$0xff] }
 0x131   :  { %1058 = vst [vmem:[#allocation2 + $0x220] sm:$0xff] %v1007_v24  ;;  %v3086_v26 = vpop.f32.mrb[38].mxu0  ;;  %1261 = vst [vmem:[#allocation2 + $0x2a0] sm:$0xff] %v1210_v25  ;;  %v3104_v27 = vpop.f32.mrb[38].mxu1  ;;  %v1728_v1 = vsel %vm1721_vm5, %v2779_v60, %v1719_v0  ;;  %v2780_v2 = vld [vmem:[#allocation2 + $0x280] ss:$0 sm:$0xff] }
 0x132   :  { %1061 = vst [vmem:[#allocation2 + $0x238] sm:$0xff] %v3086_v26  ;;  %v1010_v28 = vpop.f32.mrb[39].mxu0  ;;  %1264 = vst [vmem:[#allocation2 + $0x2b8] sm:$0xff] %v3104_v27  ;;  %v1213_v29 = vpop.f32.mrb[39].mxu1  ;;  %v1737_v4 = vsel %vm1730_vm6, %v2780_v2, %v1728_v1 }
 0x133   :  { %1059 = vst [vmem:[#allocation2 + $0x228] sm:$0xff] %v1010_v28  ;;  %1262 = vst [vmem:[#allocation2 + $0x2a8] sm:$0xff] %v1213_v29 }
 0x137   :  { %v3089_v30 = vpop.f32.mrb[40].mxu0  ;;  %v3107_v31 = vpop.f32.mrb[40].mxu1 }
 0x138   :  { %1064 = vst [vmem:[#allocation2 + $0x250] sm:$0xff] %v3089_v30  ;;  %v1023_v32 = vpop.f32.mrb[41].mxu0  ;;  %1267 = vst [vmem:[#allocation2 + $0x2d0] sm:$0xff] %v3107_v31  ;;  %v1226_v33 = vpop.f32.mrb[41].mxu1 }
 0x139   :  { %1062 = vst [vmem:[#allocation2 + $0x240] sm:$0xff] %v1023_v32  ;;  %v3090_v34 = vpop.f32.mrb[42].mxu0  ;;  %1265 = vst [vmem:[#allocation2 + $0x2c0] sm:$0xff] %v1226_v33  ;;  %v3108_v35 = vpop.f32.mrb[42].mxu1 }
 0x13a   :  { %1065 = vst [vmem:[#allocation2 + $0x258] sm:$0xff] %v3090_v34  ;;  %v1026_v36 = vpop.f32.mrb[43].mxu0  ;;  %1268 = vst [vmem:[#allocation2 + $0x2d8] sm:$0xff] %v3108_v35  ;;  %v1229_v37 = vpop.f32.mrb[43].mxu1 }
 0x13b   :  { %1063 = vst [vmem:[#allocation2 + $0x248] sm:$0xff] %v1026_v36  ;;  %1266 = vst [vmem:[#allocation2 + $0x2c8] sm:$0xff] %v1229_v37 }
 0x13f   :  { %v3093_v39 = vpop.f32.mrb[44].mxu0  ;;  %v3111_v40 = vpop.f32.mrb[44].mxu1 }
 0x140   :  { %1068 = vst [vmem:[#allocation2 + $0x270] sm:$0xff] %v3093_v39  ;;  %v1039_v41 = vpop.f32.mrb[45].mxu0  ;;  %1271 = vst [vmem:[#allocation2 + $0x2f0] sm:$0xff] %v3111_v40  ;;  %v1242_v42 = vpop.f32.mrb[45].mxu1 }
 0x141   :  { %1066 = vst [vmem:[#allocation2 + $0x260] sm:$0xff] %v1039_v41  ;;  %v3094_v43 = vpop.f32.mrb[46].mxu0  ;;  %1269 = vst [vmem:[#allocation2 + $0x2e0] sm:$0xff] %v1242_v42  ;;  %v3112_v45 = vpop.f32.mrb[46].mxu1 }
 0x142   :  { %1069 = vst [vmem:[#allocation2 + $0x278] sm:$0xff] %v3094_v43  ;;  %v1042_v46 = vpop.f32.mrb[47].mxu0  ;;  %1272 = vst [vmem:[#allocation2 + $0x2f8] sm:$0xff] %v3112_v45  ;;  %v1245_v47 = vpop.f32.mrb[47].mxu1 }
 0x143   :  { %1067 = vst [vmem:[#allocation2 + $0x268] sm:$0xff] %v1042_v46  ;;  %1270 = vst [vmem:[#allocation2 + $0x2e8] sm:$0xff] %v1245_v47 }
 0x147   :  { %v3117_v50 = vpop.f32.mrb[48].mxu0  ;;  %v3135_v52 = vpop.f32.mrb[48].mxu1 }
 0x148   :  { %1462 = vst [vmem:[#allocation2 + $0x310] sm:$0xff] %v3117_v50  ;;  %v1397_v53 = vpop.f32.mrb[49].mxu0  ;;  %1665 = vst [vmem:[#allocation2 + $0x390] sm:$0xff] %v3135_v52  ;;  %v1600_v56 = vpop.f32.mrb[49].mxu1 }
 0x149   :  { %1460 = vst [vmem:[#allocation2 + $0x300] sm:$0xff] %v1397_v53  ;;  %v3118_v58 = vpop.f32.mrb[50].mxu0  ;;  %1663 = vst [vmem:[#allocation2 + $0x380] sm:$0xff] %v1600_v56  ;;  %v3136_v61 = vpop.f32.mrb[50].mxu1 }
 0x14a   :  { %1463 = vst [vmem:[#allocation2 + $0x318] sm:$0xff] %v3118_v58  ;;  %v1400_v62 = vpop.f32.mrb[51].mxu0  ;;  %1666 = vst [vmem:[#allocation2 + $0x398] sm:$0xff] %v3136_v61  ;;  %v1603_v63 = vpop.f32.mrb[51].mxu1 }
 0x14b   :  { %1461 = vst [vmem:[#allocation2 + $0x308] sm:$0xff] %v1400_v62  ;;  %1664 = vst [vmem:[#allocation2 + $0x388] sm:$0xff] %v1603_v63 }
 0x14f   :  { %v3121_v3 = vpop.f32.mrb[52].mxu0  ;;  %v3139_v6 = vpop.f32.mrb[52].mxu1 }
 0x150   :  { %v2781_v5 = vld [vmem:[#allocation2 + $0x300] ss:$0 sm:$0xff]  ;;  %1466 = vst [vmem:[#allocation2 + $0x330] sm:$0xff] %v3121_v3  ;;  %v1413_v7 = vpop.f32.mrb[53].mxu0  ;;  %1669 = vst [vmem:[#allocation2 + $0x3b0] sm:$0xff] %v3139_v6  ;;  %v1616_v11 = vpop.f32.mrb[53].mxu1 }
 0x151   :  { %v1746_v8 = vsel %vm1739_vm7, %v2781_v5, %v1737_v4  ;;  %v2782_v9 = vld [vmem:[#allocation2 + $0x380] ss:$0 sm:$0xff]  ;;  %1464 = vst [vmem:[#allocation2 + $0x320] sm:$0xff] %v1413_v7  ;;  %v3122_v12 = vpop.f32.mrb[54].mxu0  ;;  %1667 = vst [vmem:[#allocation2 + $0x3a0] sm:$0xff] %v1616_v11  ;;  %v3140_v14 = vpop.f32.mrb[54].mxu1 }
 0x152   :  { %v1755_v13 = vsel %vm1748_vm8, %v2782_v9, %v1746_v8   ;;  %1467 = vst [vmem:[#allocation2 + $0x338] sm:$0xff] %v3122_v12  ;;  %v1416_v15 = vpop.f32.mrb[55].mxu0  ;;  %1670 = vst [vmem:[#allocation2 + $0x3b8] sm:$0xff] %v3140_v14  ;;  %v1619_v16 = vpop.f32.mrb[55].mxu1 }
 0x153   :  { %1465 = vst [vmem:[#allocation2 + $0x328] sm:$0xff] %v1416_v15  ;;  %1668 = vst [vmem:[#allocation2 + $0x3a8] sm:$0xff] %v1619_v16  ;;  %v3341_v33 = vmov (!%p2783_p12), %v1755_v13  }
 0x157   :  { %v3125_v17 = vpop.f32.mrb[56].mxu0  ;;  %v3143_v18 = vpop.f32.mrb[56].mxu1 }
 0x158   :  { %1470 = vst [vmem:[#allocation2 + $0x350] sm:$0xff] %v3125_v17  ;;  %v1429_v19 = vpop.f32.mrb[57].mxu0  ;;  %1673 = vst [vmem:[#allocation2 + $0x3d0] sm:$0xff] %v3143_v18  ;;  %v1632_v20 = vpop.f32.mrb[57].mxu1 }
 0x159   :  { %1468 = vst [vmem:[#allocation2 + $0x340] sm:$0xff] %v1429_v19  ;;  %v3126_v21 = vpop.f32.mrb[58].mxu0  ;;  %1671 = vst [vmem:[#allocation2 + $0x3c0] sm:$0xff] %v1632_v20  ;;  %v3144_v22 = vpop.f32.mrb[58].mxu1 }
 0x15a   :  { %1471 = vst [vmem:[#allocation2 + $0x358] sm:$0xff] %v3126_v21  ;;  %v1432_v23 = vpop.f32.mrb[59].mxu0  ;;  %1674 = vst [vmem:[#allocation2 + $0x3d8] sm:$0xff] %v3144_v22  ;;  %v1635_v24 = vpop.f32.mrb[59].mxu1 }
 0x15b   :  { %1469 = vst [vmem:[#allocation2 + $0x348] sm:$0xff] %v1432_v23  ;;  %1672 = vst [vmem:[#allocation2 + $0x3c8] sm:$0xff] %v1635_v24 }
 0x15d   :  { %2490 = sbr.rel (%p2783_p12) target bundleno = 476 (0x1dc), region = 75 }
 0x15f   :  { %v3129_v25 = vpop.f32.mrb[60].mxu0  ;;  %v3147_v26 = vpop.f32.mrb[60].mxu1 }
 0x160   :  { %1474 = vst [vmem:[#allocation2 + $0x370] sm:$0xff] %v3129_v25  ;;  %v1445_v27 = vpop.f32.mrb[61].mxu0  ;;  %1677 = vst [vmem:[#allocation2 + $0x3f0] sm:$0xff] %v3147_v26  ;;  %v1648_v28 = vpop.f32.mrb[61].mxu1 }
 0x161   :  { %1472 = vst [vmem:[#allocation2 + $0x360] sm:$0xff] %v1445_v27  ;;  %v3130_v29 = vpop.f32.mrb[62].mxu0  ;;  %1675 = vst [vmem:[#allocation2 + $0x3e0] sm:$0xff] %v1648_v28  ;;  %v3148_v30 = vpop.f32.mrb[62].mxu1 }
 0x162   :  { %1475 = vst [vmem:[#allocation2 + $0x378] sm:$0xff] %v3130_v29  ;;  %v1448_v31 = vpop.f32.mrb[63].mxu0  ;;  %1678 = vst [vmem:[#allocation2 + $0x3f8] sm:$0xff] %v3148_v30  ;;  %v1651_v32 = vpop.f32.mrb[63].mxu1 }
 0x163   :  { %1473 = vst [vmem:[#allocation2 + $0x368] sm:$0xff] %v1448_v31  ;;  %1676 = vst [vmem:[#allocation2 + $0x3e8] sm:$0xff] %v1651_v32 }
 0x164 LB: > { %s3367_s27 = smov 1   ;;  %s1780_s22 = scalar_lea.vmem [#allocation2], %s3347_s2  ;;  %v1775_v46 = vstv %s3347_s2  ;;  %vm1771_vm10 = vcmp.eq.s32.totalorder %v3641_v59, 0  ;;  %v3368_v54 = vmov 0.0   ;;  %s3347_s2 = sphi %s3732_s2, %s1759_s2   ;;  %v3343_v33 = vphi %v3341_v33, %v1844_v33  }
 0x165   : > { %1763 = vrot.lane.b32.xlu0 %v3343_v33, %s3367_s27  ;;  %vm1776_vm9 = vcmp.eq.s32.totalorder %v3641_v59, %v1775_v46  ;;  %s2785_s24 = sshll.u32 %s3347_s2, 3  ;;  %s1759_s2 = sadd.s32 1, %s3347_s2  }
 0x166   : > { %v1779_v50 = vsel %vm1776_vm9, -1e+30, %v3343_v33  ;;  %s1769_s28 = scalar_lea.vmem [#allocation3], %s2785_s24  ;;  %p1758_p13 = scmp.ge.s32.totalorder %s1759_s2, %s4230_s23 }
 0x16a   : > { %v2786_v34 = vld [vmem:[%s1780_s22] ss:$0 sm:$0xff] }
 0x16b   : > { %v1786_v35 = vsel %vm1685_vm1, %v2786_v34, 0.0  ;;  %v2788_v36 = vld [vmem:[%s1780_s22 + $0x80] ss:$0 sm:$0xff] }
 0x16c   : > { %v1794_v37 = vsel %vm1694_vm2, %v2788_v36, %v1786_v35  ;;  %v2790_v39 = vld [vmem:[%s1780_s22 + $0x100] ss:$0 sm:$0xff] }
 0x16d   : > { %v1802_v40 = vsel %vm1703_vm3, %v2790_v39, %v1794_v37  ;;  %v2792_v41 = vld [vmem:[%s1780_s22 + $0x180] ss:$0 sm:$0xff] }
 0x16e   : > { %v1810_v42 = vsel %vm1712_vm4, %v2792_v41, %v1802_v40  ;;  %v2794_v43 = vld [vmem:[%s1780_s22 + $0x200] ss:$0 sm:$0xff] }
 0x16f   : > { %v1818_v44 = vsel %vm1721_vm5, %v2794_v43, %v1810_v42  ;;  %v2796_v45 = vld [vmem:[%s1780_s22 + $0x280] ss:$0 sm:$0xff] }
 0x170   : > { %v1826_v47 = vsel %vm1730_vm6, %v2796_v45, %v1818_v44  ;;  %v2798_v57 = vld [vmem:[%s1780_s22 + $0x300] ss:$0 sm:$0xff] }
 0x171   : > { %v1834_v48 = vsel %vm1739_vm7, %v2798_v57, %v1826_v47  ;;  %v2800_v49 = vld [vmem:[%s1780_s22 + $0x380] ss:$0 sm:$0xff] }
 0x172   : > { %v1842_v53 = vsel %vm1748_vm8, %v2800_v49, %v1834_v48 }
 0x1d5   :  { %1761 = sbr.rel (!%p1758_p13) target bundleno = 356 (0x164), region = 81 }
 0x1d7   : > { %v1764_v51 = vpop.permute.xlu0 %1763 }
 0x1d8   : > { %vm1765_vm11 = vcmp.lt.f32.partialorder %v3343_v33, %v1764_v51  ;;  %v1774_v52 = vsel %vm1771_vm10, -1e+30, %v1764_v51 }
 0x1d9   : > { %v2784_v55 = vsel %vm1765_vm11, 1.0, %v3368_v54  ;;  %v1843_v56 = vmax.f32 %v1779_v50, %v1774_v52 }
 0x1da   : > { %1770 = vst [vmem:[%s1769_s28] sm:$0xff] %v2784_v55 }
 0x1db   : > { %v1844_v33 = vadd.f32 %v1843_v56, %v1842_v53  }
 0x1dc PF:  { %v1845_v58 = vld [vmem:[%s4214_s3] sm:$0xff]  ;;  %p2802_p0 = scmp.le.s32.totalorder %s4230_s23, 0  ;;  %v3361_v62 = vmov 4294967295  }
 0x1dd   :  { %v1846_v60 = vld [vmem:[%s4215_s4] sm:$0xff]  ;;  %v2801_v61 = vadd.s32 4294967295, %v1845_v58   ;;  %v3349_v63 = vmov (!%p2802_p0), 4294967295   ;;  %s3769_s6 = smov (!%p2802_p0), 0  }
 0x1de   :  { %2499 = sbr.rel (%p2802_p0) target bundleno = 764 (0x2fc), region = 86 }
 0x1df   :  { %v3353_v0 = vmov (!%p2802_p0), %v2801_v61  }
 0x1e5 LB: > { %s2803_s3 = sadd.s32 4294967295, %s4230_s23  ;;  %v3369_v1 = vmov 0   ;;  %vm1878_vm15 = vcmp.ne.s32.totalorder %v3355_v0, 0  ;;  %s3359_s6 = sphi %s3769_s6, %s1851_s6   ;;  %v3355_v0 = vphi %v3353_v0, %v1885_v0   ;;  %v3351_v63 = vphi %v3349_v63, %v3350_v63  }
 0x1e6   : > { %3277 = vset.pattern.permute.xlu0 %v3369_v1  ;;  %3278 = vset.pattern.permute.xlu1 %v3369_v1  ;;  %s1857_s4 = ssub.s32 %s2803_s3, %s3359_s6  ;;  %s1851_s6 = sadd.s32 1, %s3359_s6  }
 0x1e7   : > { %1872 = vperm.xlu0 %3277, %v3355_v0   ;;  %v1858_v2 = vstv %s1857_s4  ;;  %s2804_s7 = sshll.u32 %s1857_s4, 3  ;;  %p1850_p1 = scmp.ge.s32.totalorder %s1851_s6, %s4230_s23 }
 0x1e8   : > { %vm1859_vm12 = vcmp.lt.s32.totalorder %v1858_v2, %v1846_v60  ;;  %s1869_s8 = scalar_lea.vmem [#allocation3], %s2804_s7  ;;  %vm1861_vm14 = vcmp.eq.s32.totalorder %v3641_v59, %v1858_v2  ;;  %vm1880_vm0 = vcmp.eq.s32.totalorder %v3355_v0, %v1858_v2 }
 0x1e9   : > { %v1860_v3 = vsel %vm1859_vm12, %v3355_v0, 4294967295  ;;  %v1870_v4 = vld [vmem:[%s1869_s8] sm:$0xff]  ;;  %vm1879_vm1 = vmand %vm1859_vm12, %vm1878_vm15 }
 0x1ea   : > { %1865 = vperm.xlu1 %3278, %v1860_v3  }
 0x266   : > { %v1873_v5 = vpop.permute.xlu0 %1872 }
 0x267   : > { %vm1874_vm13 = vcmp.eq.s32.totalorder %v3641_v59, %v1873_v5 }
 0x268   : > { %v1875_v6 = vsel %vm1874_vm13, %v1870_v4, 0.0 }
 0x269   : > { %1876 = vadd.xlane.f32.xlu0 %v1875_v6  ;;  %v1866_v7 = vpop.permute.xlu1 %1865 }
 0x26a   : > { %v1867_v8 = vsel %vm1861_vm14, %v1866_v7, %v3351_v63  }
 0x26b   : > { %v3350_v63 = vmov %v1867_v8   ;;  %v3362_v62 = vmov (%p1850_p1), %v1867_v8  }
 0x2f5   :  { %1853 = sbr.rel (!%p1850_p1) target bundleno = 485 (0x1e5), region = 92 }
 0x2f6   : > { %v1877_v9 = vpop.xlane.xlu0 %1876 }
 0x2f7   : > { %vm1881_vm2 = vcmp.gt.f32.partialorder %v1877_v9, 0.0 }
 0x2f8   : > { %vm1882_vm3 = vmor %vm1880_vm0, %vm1881_vm2 }
 0x2f9   : > { %vm1883_vm4 = vmand %vm1879_vm1, %vm1882_vm3 }
 0x2fa   : > { %v1884_v11 = vsel %vm1883_vm4, 1, %v3369_v1 }
 0x2fb   : > { %v1885_v0 = vsub.s32 %v3355_v0, %v1884_v11  }
 0x2fc PF:  { %v1903_v12 = vsub.s32 0, %v3705_v38  ;;  %v3788_v13 = vadd.s32 8, %v3705_v38  ;;  %v3791_v14 = vadd.s32 16, %v3705_v38  ;;  %v3794_v15 = vadd.s32 24, %v3705_v38  ;;  %s3370_s23 = smov [#allocation6]   ;;  %v3363_v62 = vphi %v3361_v62, %v3362_v62  }
 0x2fd   :  { %v3797_v16 = vadd.s32 32, %v3705_v38  ;;  %v3800_v59 = vadd.s32 40, %v3705_v38  ;;  %v3803_v17 = vadd.s32 48, %v3705_v38  ;;  %v3806_v18 = vadd.s32 56, %v3705_v38  ;;  %s2457_s9 = sshll.u32 %s3370_s23, 4  ;;  %s2458_s9 = int_to_ptr.vmem [resolvable:$true] %s2457_s9 }
 0x2fe   :  { %v1904_v19 = vrot.slane %v3363_v62, %v1903_v12  ;;  %v3810_v20 = vadd.s32 64, %v3705_v38  ;;  %v3813_v21 = vadd.s32 72, %v3705_v38  ;;  %v3816_v22 = vadd.s32 80, %v3705_v38  ;;  %s3291_s11 = scalar_lea.vmem %s2458_s9, 16384  ;;  %p3296_p3 = scmp.lt.s32.totalorder %s2458_s9, %s2458_s9 }
 0x2ff   :  { %v3819_v23 = vadd.s32 88, %v3705_v38  ;;  %v3822_v24 = vadd.s32 96, %v3705_v38  ;;  %v3825_v25 = vadd.s32 104, %v3705_v38  ;;  %v3828_v26 = vadd.s32 112, %v3705_v38  ;;  %p3292_p2 = scmp.ne.s32.totalorder %s2458_s9, %s3291_s11  ;;  %p3297_p4 = scmp.lt.s32.totalorder %s3291_s11, %s3291_s11 }
 0x300   :  { %vm1905_vm5 = vcmp.eq.s32.totalorder %v3705_v38, %v1904_v19  ;;  %vm1906_vm6 = vcmp.eq.s32.totalorder %v3788_v13, %v1904_v19  ;;  %vm1907_vm7 = vcmp.eq.s32.totalorder %v3791_v14, %v1904_v19  ;;  %vm1908_vm8 = vcmp.eq.s32.totalorder %v3794_v15, %v1904_v19 }
 0x301   :  { %v2805_v27 = vsel %vm1905_vm5, 1.0, %v3366_v10  ;;  %v2806_v28 = vsel %vm1906_vm6, 1.0, %v3366_v10  ;;  %v2807_v29 = vsel %vm1907_vm7, 1.0, %v3366_v10  ;;  %v2808_v30 = vsel %vm1908_vm8, 1.0, %v3366_v10  ;;  %p3298_p5 = por %p3297_p4, %p3296_p3 }
 0x302   :  { %1953 = vst [vmem:[#allocation6] sm:$0xff] %v2805_v27  ;;  %1954 = vst [vmem:[#allocation6 + $0x8] sm:$0xff] %v2806_v28  ;;  %vm1909_vm9 = vcmp.eq.s32.totalorder %v3797_v16, %v1904_v19  ;;  %vm1910_vm10 = vcmp.eq.s32.totalorder %v3800_v59, %v1904_v19  ;;  %vm1911_vm11 = vcmp.eq.s32.totalorder %v3803_v17, %v1904_v19  ;;  %v3858_v40 = vadd.s32 120, %v3705_v38 }
 0x303   :  { %1955 = vst [vmem:[#allocation6 + $0x10] sm:$0xff] %v2807_v29  ;;  %1956 = vst [vmem:[#allocation6 + $0x18] sm:$0xff] %v2808_v30  ;;  %vm1912_vm12 = vcmp.eq.s32.totalorder %v3806_v18, %v1904_v19  ;;  %v2809_v31 = vsel %vm1909_vm9, 1.0, %v3366_v10  ;;  %v2810_v32 = vsel %vm1910_vm10, 1.0, %v3366_v10  ;;  %v2811_v33 = vsel %vm1911_vm11, 1.0, %v3366_v10  ;;  %p3299_p6 = pnand %p3298_p5, %p3292_p2 }
 0x304   :  { %v2812_v34 = vsel %vm1912_vm12, 1.0, %v3366_v10  ;;  %1957 = vst [vmem:[#allocation6 + $0x20] sm:$0xff] %v2809_v31  ;;  %1958 = vst [vmem:[#allocation6 + $0x28] sm:$0xff] %v2810_v32  ;;  %vm1913_vm13 = vcmp.eq.s32.totalorder %v3810_v20, %v1904_v19  ;;  %vm1914_vm14 = vcmp.eq.s32.totalorder %v3813_v21, %v1904_v19  ;;  %vm1915_vm15 = vcmp.eq.s32.totalorder %v3816_v22, %v1904_v19 }
 0x305   :  { %1959 = vst [vmem:[#allocation6 + $0x30] sm:$0xff] %v2811_v33  ;;  %1960 = vst [vmem:[#allocation6 + $0x38] sm:$0xff] %v2812_v34  ;;  %vm1916_vm0 = vcmp.eq.s32.totalorder %v3819_v23, %v1904_v19  ;;  %v2813_v35 = vsel %vm1913_vm13, 1.0, %v3366_v10  ;;  %v2814_v36 = vsel %vm1914_vm14, 1.0, %v3366_v10  ;;  %v2815_v37 = vsel %vm1915_vm15, 1.0, %v3366_v10 }
 0x306   :  { %v2816_v39 = vsel %vm1916_vm0, 1.0, %v3366_v10  ;;  %1961 = vst [vmem:[#allocation6 + $0x40] sm:$0xff] %v2813_v35  ;;  %1962 = vst [vmem:[#allocation6 + $0x48] sm:$0xff] %v2814_v36  ;;  %vm1917_vm1 = vcmp.eq.s32.totalorder %v3822_v24, %v1904_v19  ;;  %vm1918_vm2 = vcmp.eq.s32.totalorder %v3825_v25, %v1904_v19  ;;  %vm1919_vm3 = vcmp.eq.s32.totalorder %v3828_v26, %v1904_v19 }
 0x307   :  { %1963 = vst [vmem:[#allocation6 + $0x50] sm:$0xff] %v2815_v37  ;;  %1964 = vst [vmem:[#allocation6 + $0x58] sm:$0xff] %v2816_v39  ;;  %v2817_v41 = vsel %vm1917_vm1, 1.0, %v3366_v10  ;;  %v2818_v42 = vsel %vm1918_vm2, 1.0, %v3366_v10  ;;  %v2819_v43 = vsel %vm1919_vm3, 1.0, %v3366_v10  ;;  %v1971_v44 = vsub.s32 1, %v3705_v38 }
 0x308   :  { %1965 = vst [vmem:[#allocation6 + $0x60] sm:$0xff] %v2817_v41  ;;  %1966 = vst [vmem:[#allocation6 + $0x68] sm:$0xff] %v2818_v42  ;;  %vm1920_vm4 = vcmp.eq.s32.totalorder %v3858_v40, %v1904_v19  ;;  %v2040_v45 = vsub.s32 2, %v3705_v38  ;;  %v2109_v46 = vsub.s32 3, %v3705_v38  ;;  %v2178_v47 = vsub.s32 4, %v3705_v38 }
 0x309   :  { %1967 = vst [vmem:[#allocation6 + $0x70] sm:$0xff] %v2819_v43  ;;  %v2820_v57 = vsel %vm1920_vm4, 1.0, %v3366_v10  ;;  %v1972_v48 = vrot.slane %v3363_v62, %v1971_v44  ;;  %v2247_v49 = vsub.s32 5, %v3705_v38  ;;  %v2316_v50 = vsub.s32 6, %v3705_v38 }
 0x30a   :  { %1968 = vst [vmem:[#allocation6 + $0x78] sm:$0xff] %v2820_v57  ;;  %v3873_v51 = vrot.slane %v3363_v62, %v2040_v45  ;;  %v3876_v52 = vrot.slane %v3363_v62, %v2109_v46  ;;  %v3879_v53 = vrot.slane %v3363_v62, %v2178_v47  ;;  %v2385_v54 = vsub.s32 7, %v3705_v38 }
 0x30b   :  { %vm1973_vm5 = vcmp.eq.s32.totalorder %v3705_v38, %v1972_v48  ;;  %vm1974_vm6 = vcmp.eq.s32.totalorder %v3788_v13, %v1972_v48  ;;  %vm1975_vm7 = vcmp.eq.s32.totalorder %v3791_v14, %v1972_v48  ;;  %vm1976_vm8 = vcmp.eq.s32.totalorder %v3794_v15, %v1972_v48 }
 0x30c   :  { %v2821_v55 = vsel %vm1973_vm5, 1.0, %v3366_v10  ;;  %v2822_v56 = vsel %vm1974_vm6, 1.0, %v3366_v10  ;;  %v2823_v58 = vsel %vm1975_vm7, 1.0, %v3366_v10  ;;  %v2824_v60 = vsel %vm1976_vm8, 1.0, %v3366_v10 }
 0x30d   :  { %2022 = vst [vmem:[#allocation6 + $0x80] sm:$0xff] %v2821_v55  ;;  %2023 = vst [vmem:[#allocation6 + $0x88] sm:$0xff] %v2822_v56  ;;  %vm1977_vm9 = vcmp.eq.s32.totalorder %v3797_v16, %v1972_v48  ;;  %vm1978_vm10 = vcmp.eq.s32.totalorder %v3800_v59, %v1972_v48  ;;  %vm1979_vm11 = vcmp.eq.s32.totalorder %v3803_v17, %v1972_v48 }
 0x30e   :  { %2024 = vst [vmem:[#allocation6 + $0x90] sm:$0xff] %v2823_v58  ;;  %2025 = vst [vmem:[#allocation6 + $0x98] sm:$0xff] %v2824_v60  ;;  %vm1980_vm12 = vcmp.eq.s32.totalorder %v3806_v18, %v1972_v48  ;;  %v2825_v61 = vsel %vm1977_vm9, 1.0, %v3366_v10  ;;  %v2826_v63 = vsel %vm1978_vm10, 1.0, %v3366_v10  ;;  %v2827_v0 = vsel %vm1979_vm11, 1.0, %v3366_v10 }
 0x30f   :  { %v2828_v1 = vsel %vm1980_vm12, 1.0, %v3366_v10  ;;  %2026 = vst [vmem:[#allocation6 + $0xa0] sm:$0xff] %v2825_v61  ;;  %2027 = vst [vmem:[#allocation6 + $0xa8] sm:$0xff] %v2826_v63  ;;  %vm1981_vm13 = vcmp.eq.s32.totalorder %v3810_v20, %v1972_v48  ;;  %vm1982_vm14 = vcmp.eq.s32.totalorder %v3813_v21, %v1972_v48  ;;  %vm1983_vm15 = vcmp.eq.s32.totalorder %v3816_v22, %v1972_v48 }
 0x310   :  { %2028 = vst [vmem:[#allocation6 + $0xb0] sm:$0xff] %v2827_v0  ;;  %2029 = vst [vmem:[#allocation6 + $0xb8] sm:$0xff] %v2828_v1  ;;  %vm1984_vm0 = vcmp.eq.s32.totalorder %v3819_v23, %v1972_v48  ;;  %v2829_v2 = vsel %vm1981_vm13, 1.0, %v3366_v10  ;;  %v2830_v3 = vsel %vm1982_vm14, 1.0, %v3366_v10  ;;  %v2831_v4 = vsel %vm1983_vm15, 1.0, %v3366_v10 }
 0x311   :  { %v2832_v5 = vsel %vm1984_vm0, 1.0, %v3366_v10  ;;  %2030 = vst [vmem:[#allocation6 + $0xc0] sm:$0xff] %v2829_v2  ;;  %2031 = vst [vmem:[#allocation6 + $0xc8] sm:$0xff] %v2830_v3  ;;  %vm1985_vm1 = vcmp.eq.s32.totalorder %v3822_v24, %v1972_v48  ;;  %vm1986_vm2 = vcmp.eq.s32.totalorder %v3825_v25, %v1972_v48  ;;  %vm1987_vm3 = vcmp.eq.s32.totalorder %v3828_v26, %v1972_v48 }
 0x312   :  { %2032 = vst [vmem:[#allocation6 + $0xd0] sm:$0xff] %v2831_v4  ;;  %2033 = vst [vmem:[#allocation6 + $0xd8] sm:$0xff] %v2832_v5  ;;  %vm1988_vm4 = vcmp.eq.s32.totalorder %v3858_v40, %v1972_v48  ;;  %v2833_v6 = vsel %vm1985_vm1, 1.0, %v3366_v10  ;;  %v2834_v7 = vsel %vm1986_vm2, 1.0, %v3366_v10  ;;  %v2835_v8 = vsel %vm1987_vm3, 1.0, %v3366_v10 }
 0x313   :  { %v2836_v9 = vsel %vm1988_vm4, 1.0, %v3366_v10  ;;  %2034 = vst [vmem:[#allocation6 + $0xe0] sm:$0xff] %v2833_v6  ;;  %2035 = vst [vmem:[#allocation6 + $0xe8] sm:$0xff] %v2834_v7  ;;  %vm2042_vm5 = vcmp.eq.s32.totalorder %v3705_v38, %v3873_v51  ;;  %vm2043_vm6 = vcmp.eq.s32.totalorder %v3788_v13, %v3873_v51  ;;  %vm2044_vm7 = vcmp.eq.s32.totalorder %v3791_v14, %v3873_v51 }
 0x314   :  { %2036 = vst [vmem:[#allocation6 + $0xf0] sm:$0xff] %v2835_v8  ;;  %2037 = vst [vmem:[#allocation6 + $0xf8] sm:$0xff] %v2836_v9  ;;  %vm2045_vm8 = vcmp.eq.s32.totalorder %v3794_v15, %v3873_v51  ;;  %v2837_v11 = vsel %vm2042_vm5, 1.0, %v3366_v10  ;;  %v2838_v12 = vsel %vm2043_vm6, 1.0, %v3366_v10  ;;  %v2839_v19 = vsel %vm2044_vm7, 1.0, %v3366_v10 }
 0x315   :  { %v2840_v27 = vsel %vm2045_vm8, 1.0, %v3366_v10  ;;  %2091 = vst [vmem:[#allocation6 + $0x100] sm:$0xff] %v2837_v11  ;;  %2092 = vst [vmem:[#allocation6 + $0x108] sm:$0xff] %v2838_v12  ;;  %vm2046_vm9 = vcmp.eq.s32.totalorder %v3797_v16, %v3873_v51  ;;  %vm2047_vm10 = vcmp.eq.s32.totalorder %v3800_v59, %v3873_v51  ;;  %vm2048_vm11 = vcmp.eq.s32.totalorder %v3803_v17, %v3873_v51 }
 0x316   :  { %2093 = vst [vmem:[#allocation6 + $0x110] sm:$0xff] %v2839_v19  ;;  %2094 = vst [vmem:[#allocation6 + $0x118] sm:$0xff] %v2840_v27  ;;  %vm2049_vm12 = vcmp.eq.s32.totalorder %v3806_v18, %v3873_v51  ;;  %v2841_v28 = vsel %vm2046_vm9, 1.0, %v3366_v10  ;;  %v2842_v29 = vsel %vm2047_vm10, 1.0, %v3366_v10  ;;  %v2843_v30 = vsel %vm2048_vm11, 1.0, %v3366_v10 }
 0x317   :  { %v2844_v31 = vsel %vm2049_vm12, 1.0, %v3366_v10  ;;  %2095 = vst [vmem:[#allocation6 + $0x120] sm:$0xff] %v2841_v28  ;;  %2096 = vst [vmem:[#allocation6 + $0x128] sm:$0xff] %v2842_v29  ;;  %vm2050_vm13 = vcmp.eq.s32.totalorder %v3810_v20, %v3873_v51  ;;  %vm2051_vm14 = vcmp.eq.s32.totalorder %v3813_v21, %v3873_v51  ;;  %vm2052_vm15 = vcmp.eq.s32.totalorder %v3816_v22, %v3873_v51 }
 0x318   :  { %2097 = vst [vmem:[#allocation6 + $0x130] sm:$0xff] %v2843_v30  ;;  %2098 = vst [vmem:[#allocation6 + $0x138] sm:$0xff] %v2844_v31  ;;  %vm2053_vm0 = vcmp.eq.s32.totalorder %v3819_v23, %v3873_v51  ;;  %v2845_v32 = vsel %vm2050_vm13, 1.0, %v3366_v10  ;;  %v2846_v33 = vsel %vm2051_vm14, 1.0, %v3366_v10  ;;  %v2847_v34 = vsel %vm2052_vm15, 1.0, %v3366_v10 }
 0x319   :  { %v2848_v35 = vsel %vm2053_vm0, 1.0, %v3366_v10  ;;  %2099 = vst [vmem:[#allocation6 + $0x140] sm:$0xff] %v2845_v32  ;;  %2100 = vst [vmem:[#allocation6 + $0x148] sm:$0xff] %v2846_v33  ;;  %vm2054_vm1 = vcmp.eq.s32.totalorder %v3822_v24, %v3873_v51  ;;  %vm2055_vm2 = vcmp.eq.s32.totalorder %v3825_v25, %v3873_v51  ;;  %vm2056_vm3 = vcmp.eq.s32.totalorder %v3828_v26, %v3873_v51 }
 0x31a   :  { %2101 = vst [vmem:[#allocation6 + $0x150] sm:$0xff] %v2847_v34  ;;  %2102 = vst [vmem:[#allocation6 + $0x158] sm:$0xff] %v2848_v35  ;;  %vm2057_vm4 = vcmp.eq.s32.totalorder %v3858_v40, %v3873_v51  ;;  %v2849_v36 = vsel %vm2054_vm1, 1.0, %v3366_v10  ;;  %v2850_v37 = vsel %vm2055_vm2, 1.0, %v3366_v10  ;;  %v2851_v39 = vsel %vm2056_vm3, 1.0, %v3366_v10 }
 0x31b   :  { %v2852_v41 = vsel %vm2057_vm4, 1.0, %v3366_v10  ;;  %2103 = vst [vmem:[#allocation6 + $0x160] sm:$0xff] %v2849_v36  ;;  %2104 = vst [vmem:[#allocation6 + $0x168] sm:$0xff] %v2850_v37  ;;  %vm2111_vm5 = vcmp.eq.s32.totalorder %v3705_v38, %v3876_v52  ;;  %vm2112_vm6 = vcmp.eq.s32.totalorder %v3788_v13, %v3876_v52  ;;  %vm2113_vm7 = vcmp.eq.s32.totalorder %v3791_v14, %v3876_v52 }
 0x31c   :  { %2105 = vst [vmem:[#allocation6 + $0x170] sm:$0xff] %v2851_v39  ;;  %2106 = vst [vmem:[#allocation6 + $0x178] sm:$0xff] %v2852_v41  ;;  %vm2114_vm8 = vcmp.eq.s32.totalorder %v3794_v15, %v3876_v52  ;;  %v2853_v42 = vsel %vm2111_vm5, 1.0, %v3366_v10  ;;  %v2854_v43 = vsel %vm2112_vm6, 1.0, %v3366_v10  ;;  %v2855_v44 = vsel %vm2113_vm7, 1.0, %v3366_v10 }
 0x31d   :  { %v2856_v45 = vsel %vm2114_vm8, 1.0, %v3366_v10  ;;  %2160 = vst [vmem:[#allocation6 + $0x180] sm:$0xff] %v2853_v42  ;;  %2161 = vst [vmem:[#allocation6 + $0x188] sm:$0xff] %v2854_v43  ;;  %vm2115_vm9 = vcmp.eq.s32.totalorder %v3797_v16, %v3876_v52  ;;  %vm2116_vm10 = vcmp.eq.s32.totalorder %v3800_v59, %v3876_v52  ;;  %vm2117_vm11 = vcmp.eq.s32.totalorder %v3803_v17, %v3876_v52 }
 0x31e   :  { %2162 = vst [vmem:[#allocation6 + $0x190] sm:$0xff] %v2855_v44  ;;  %2163 = vst [vmem:[#allocation6 + $0x198] sm:$0xff] %v2856_v45  ;;  %vm2118_vm12 = vcmp.eq.s32.totalorder %v3806_v18, %v3876_v52  ;;  %v2857_v46 = vsel %vm2115_vm9, 1.0, %v3366_v10  ;;  %v2858_v47 = vsel %vm2116_vm10, 1.0, %v3366_v10  ;;  %v2859_v57 = vsel %vm2117_vm11, 1.0, %v3366_v10 }
 0x31f   :  { %v2860_v48 = vsel %vm2118_vm12, 1.0, %v3366_v10  ;;  %2164 = vst [vmem:[#allocation6 + $0x1a0] sm:$0xff] %v2857_v46  ;;  %2165 = vst [vmem:[#allocation6 + $0x1a8] sm:$0xff] %v2858_v47  ;;  %vm2119_vm13 = vcmp.eq.s32.totalorder %v3810_v20, %v3876_v52  ;;  %vm2120_vm14 = vcmp.eq.s32.totalorder %v3813_v21, %v3876_v52  ;;  %vm2121_vm15 = vcmp.eq.s32.totalorder %v3816_v22, %v3876_v52 }
 0x320   :  { %2166 = vst [vmem:[#allocation6 + $0x1b0] sm:$0xff] %v2859_v57  ;;  %2167 = vst [vmem:[#allocation6 + $0x1b8] sm:$0xff] %v2860_v48  ;;  %vm2122_vm0 = vcmp.eq.s32.totalorder %v3819_v23, %v3876_v52  ;;  %v2861_v51 = vsel %vm2119_vm13, 1.0, %v3366_v10  ;;  %v2862_v55 = vsel %vm2120_vm14, 1.0, %v3366_v10  ;;  %v2863_v56 = vsel %vm2121_vm15, 1.0, %v3366_v10 }
 0x321   :  { %v2864_v58 = vsel %vm2122_vm0, 1.0, %v3366_v10  ;;  %2168 = vst [vmem:[#allocation6 + $0x1c0] sm:$0xff] %v2861_v51  ;;  %2169 = vst [vmem:[#allocation6 + $0x1c8] sm:$0xff] %v2862_v55  ;;  %vm2123_vm1 = vcmp.eq.s32.totalorder %v3822_v24, %v3876_v52  ;;  %vm2124_vm2 = vcmp.eq.s32.totalorder %v3825_v25, %v3876_v52  ;;  %vm2125_vm3 = vcmp.eq.s32.totalorder %v3828_v26, %v3876_v52 }
 0x322   :  { %2170 = vst [vmem:[#allocation6 + $0x1d0] sm:$0xff] %v2863_v56  ;;  %2171 = vst [vmem:[#allocation6 + $0x1d8] sm:$0xff] %v2864_v58  ;;  %vm2126_vm4 = vcmp.eq.s32.totalorder %v3858_v40, %v3876_v52  ;;  %v2865_v60 = vsel %vm2123_vm1, 1.0, %v3366_v10  ;;  %v2866_v61 = vsel %vm2124_vm2, 1.0, %v3366_v10  ;;  %v2867_v63 = vsel %vm2125_vm3, 1.0, %v3366_v10 }
 0x323   :  { %v2868_v0 = vsel %vm2126_vm4, 1.0, %v3366_v10  ;;  %2172 = vst [vmem:[#allocation6 + $0x1e0] sm:$0xff] %v2865_v60  ;;  %2173 = vst [vmem:[#allocation6 + $0x1e8] sm:$0xff] %v2866_v61  ;;  %vm2180_vm5 = vcmp.eq.s32.totalorder %v3705_v38, %v3879_v53  ;;  %vm2181_vm6 = vcmp.eq.s32.totalorder %v3788_v13, %v3879_v53  ;;  %vm2182_vm7 = vcmp.eq.s32.totalorder %v3791_v14, %v3879_v53 }
 0x324   :  { %2174 = vst [vmem:[#allocation6 + $0x1f0] sm:$0xff] %v2867_v63  ;;  %2175 = vst [vmem:[#allocation6 + $0x1f8] sm:$0xff] %v2868_v0  ;;  %vm2183_vm8 = vcmp.eq.s32.totalorder %v3794_v15, %v3879_v53  ;;  %v2869_v52 = vsel %vm2180_vm5, 1.0, %v3366_v10  ;;  %v2870_v1 = vsel %vm2181_vm6, 1.0, %v3366_v10  ;;  %v2871_v2 = vsel %vm2182_vm7, 1.0, %v3366_v10 }
 0x325   :  { %v2872_v3 = vsel %vm2183_vm8, 1.0, %v3366_v10  ;;  %2229 = vst [vmem:[#allocation6 + $0x200] sm:$0xff] %v2869_v52  ;;  %2230 = vst [vmem:[#allocation6 + $0x208] sm:$0xff] %v2870_v1  ;;  %vm2184_vm9 = vcmp.eq.s32.totalorder %v3797_v16, %v3879_v53  ;;  %vm2185_vm10 = vcmp.eq.s32.totalorder %v3800_v59, %v3879_v53  ;;  %vm2186_vm11 = vcmp.eq.s32.totalorder %v3803_v17, %v3879_v53 }
 0x326   :  { %2231 = vst [vmem:[#allocation6 + $0x210] sm:$0xff] %v2871_v2  ;;  %2232 = vst [vmem:[#allocation6 + $0x218] sm:$0xff] %v2872_v3  ;;  %vm2187_vm12 = vcmp.eq.s32.totalorder %v3806_v18, %v3879_v53  ;;  %v2873_v4 = vsel %vm2184_vm9, 1.0, %v3366_v10  ;;  %v2874_v5 = vsel %vm2185_vm10, 1.0, %v3366_v10  ;;  %v2875_v6 = vsel %vm2186_vm11, 1.0, %v3366_v10 }
 0x327   :  { %v2876_v7 = vsel %vm2187_vm12, 1.0, %v3366_v10  ;;  %2233 = vst [vmem:[#allocation6 + $0x220] sm:$0xff] %v2873_v4  ;;  %2234 = vst [vmem:[#allocation6 + $0x228] sm:$0xff] %v2874_v5  ;;  %vm2188_vm13 = vcmp.eq.s32.totalorder %v3810_v20, %v3879_v53  ;;  %vm2189_vm14 = vcmp.eq.s32.totalorder %v3813_v21, %v3879_v53  ;;  %vm2190_vm15 = vcmp.eq.s32.totalorder %v3816_v22, %v3879_v53 }
 0x328   :  { %2235 = vst [vmem:[#allocation6 + $0x230] sm:$0xff] %v2875_v6  ;;  %2236 = vst [vmem:[#allocation6 + $0x238] sm:$0xff] %v2876_v7  ;;  %vm2191_vm0 = vcmp.eq.s32.totalorder %v3819_v23, %v3879_v53  ;;  %v2877_v8 = vsel %vm2188_vm13, 1.0, %v3366_v10  ;;  %v2878_v9 = vsel %vm2189_vm14, 1.0, %v3366_v10  ;;  %v2879_v11 = vsel %vm2190_vm15, 1.0, %v3366_v10 }
 0x329   :  { %v2880_v12 = vsel %vm2191_vm0, 1.0, %v3366_v10  ;;  %2237 = vst [vmem:[#allocation6 + $0x240] sm:$0xff] %v2877_v8  ;;  %2238 = vst [vmem:[#allocation6 + $0x248] sm:$0xff] %v2878_v9  ;;  %vm2192_vm1 = vcmp.eq.s32.totalorder %v3822_v24, %v3879_v53  ;;  %vm2193_vm2 = vcmp.eq.s32.totalorder %v3825_v25, %v3879_v53  ;;  %vm2194_vm3 = vcmp.eq.s32.totalorder %v3828_v26, %v3879_v53 }
 0x32a   :  { %2239 = vst [vmem:[#allocation6 + $0x250] sm:$0xff] %v2879_v11  ;;  %2240 = vst [vmem:[#allocation6 + $0x258] sm:$0xff] %v2880_v12  ;;  %vm2195_vm4 = vcmp.eq.s32.totalorder %v3858_v40, %v3879_v53  ;;  %v2881_v19 = vsel %vm2192_vm1, 1.0, %v3366_v10  ;;  %v2882_v27 = vsel %vm2193_vm2, 1.0, %v3366_v10  ;;  %v2883_v28 = vsel %vm2194_vm3, 1.0, %v3366_v10 }
 0x32b   :  { %v2884_v29 = vsel %vm2195_vm4, 1.0, %v3366_v10  ;;  %2241 = vst [vmem:[#allocation6 + $0x260] sm:$0xff] %v2881_v19  ;;  %2242 = vst [vmem:[#allocation6 + $0x268] sm:$0xff] %v2882_v27  ;;  %v2248_v30 = vrot.slane %v3363_v62, %v2247_v49  ;;  %v4064_v53 = vrot.slane %v3363_v62, %v2316_v50  ;;  %v4069_v31 = vrot.slane %v3363_v62, %v2385_v54 }
 0x32c   :  { %2243 = vst [vmem:[#allocation6 + $0x270] sm:$0xff] %v2883_v28  ;;  %2244 = vst [vmem:[#allocation6 + $0x278] sm:$0xff] %v2884_v29 }
 0x32d   :  { %vm2249_vm5 = vcmp.eq.s32.totalorder %v3705_v38, %v2248_v30  ;;  %vm2250_vm6 = vcmp.eq.s32.totalorder %v3788_v13, %v2248_v30  ;;  %vm2251_vm7 = vcmp.eq.s32.totalorder %v3791_v14, %v2248_v30  ;;  %vm2252_vm8 = vcmp.eq.s32.totalorder %v3794_v15, %v2248_v30 }
 0x32e   :  { %v2885_v49 = vsel %vm2249_vm5, 1.0, %v3366_v10  ;;  %v2886_v32 = vsel %vm2250_vm6, 1.0, %v3366_v10  ;;  %v2887_v50 = vsel %vm2251_vm7, 1.0, %v3366_v10  ;;  %v2888_v33 = vsel %vm2252_vm8, 1.0, %v3366_v10 }
 0x32f   :  { %2298 = vst [vmem:[#allocation6 + $0x280] sm:$0xff] %v2885_v49  ;;  %2299 = vst [vmem:[#allocation6 + $0x288] sm:$0xff] %v2886_v32  ;;  %vm2253_vm9 = vcmp.eq.s32.totalorder %v3797_v16, %v2248_v30  ;;  %vm2254_vm10 = vcmp.eq.s32.totalorder %v3800_v59, %v2248_v30  ;;  %vm2255_vm11 = vcmp.eq.s32.totalorder %v3803_v17, %v2248_v30 }
 0x330   :  { %2300 = vst [vmem:[#allocation6 + $0x290] sm:$0xff] %v2887_v50  ;;  %2301 = vst [vmem:[#allocation6 + $0x298] sm:$0xff] %v2888_v33  ;;  %vm2256_vm12 = vcmp.eq.s32.totalorder %v3806_v18, %v2248_v30  ;;  %v2889_v62 = vsel %vm2253_vm9, 1.0, %v3366_v10  ;;  %v2890_v54 = vsel %vm2254_vm10, 1.0, %v3366_v10  ;;  %v2891_v34 = vsel %vm2255_vm11, 1.0, %v3366_v10 }
 0x331   :  { %v2892_v35 = vsel %vm2256_vm12, 1.0, %v3366_v10  ;;  %2302 = vst [vmem:[#allocation6 + $0x2a0] sm:$0xff] %v2889_v62  ;;  %2303 = vst [vmem:[#allocation6 + $0x2a8] sm:$0xff] %v2890_v54  ;;  %vm2257_vm13 = vcmp.eq.s32.totalorder %v3810_v20, %v2248_v30  ;;  %vm2258_vm14 = vcmp.eq.s32.totalorder %v3813_v21, %v2248_v30  ;;  %vm2259_vm15 = vcmp.eq.s32.totalorder %v3816_v22, %v2248_v30 }
 0x332   :  { %2304 = vst [vmem:[#allocation6 + $0x2b0] sm:$0xff] %v2891_v34  ;;  %2305 = vst [vmem:[#allocation6 + $0x2b8] sm:$0xff] %v2892_v35  ;;  %vm2260_vm0 = vcmp.eq.s32.totalorder %v3819_v23, %v2248_v30  ;;  %v2893_v36 = vsel %vm2257_vm13, 1.0, %v3366_v10  ;;  %v2894_v37 = vsel %vm2258_vm14, 1.0, %v3366_v10  ;;  %v2895_v39 = vsel %vm2259_vm15, 1.0, %v3366_v10 }
 0x333   :  { %v2896_v41 = vsel %vm2260_vm0, 1.0, %v3366_v10  ;;  %2306 = vst [vmem:[#allocation6 + $0x2c0] sm:$0xff] %v2893_v36  ;;  %2307 = vst [vmem:[#allocation6 + $0x2c8] sm:$0xff] %v2894_v37  ;;  %vm2261_vm1 = vcmp.eq.s32.totalorder %v3822_v24, %v2248_v30  ;;  %vm2262_vm2 = vcmp.eq.s32.totalorder %v3825_v25, %v2248_v30  ;;  %vm2263_vm3 = vcmp.eq.s32.totalorder %v3828_v26, %v2248_v30 }
 0x334   :  { %2308 = vst [vmem:[#allocation6 + $0x2d0] sm:$0xff] %v2895_v39  ;;  %2309 = vst [vmem:[#allocation6 + $0x2d8] sm:$0xff] %v2896_v41  ;;  %vm2264_vm4 = vcmp.eq.s32.totalorder %v3858_v40, %v2248_v30  ;;  %v2897_v42 = vsel %vm2261_vm1, 1.0, %v3366_v10  ;;  %v2898_v43 = vsel %vm2262_vm2, 1.0, %v3366_v10  ;;  %v2899_v44 = vsel %vm2263_vm3, 1.0, %v3366_v10 }
 0x335   :  { %v2900_v45 = vsel %vm2264_vm4, 1.0, %v3366_v10  ;;  %2310 = vst [vmem:[#allocation6 + $0x2e0] sm:$0xff] %v2897_v42  ;;  %2311 = vst [vmem:[#allocation6 + $0x2e8] sm:$0xff] %v2898_v43  ;;  %vm2318_vm5 = vcmp.eq.s32.totalorder %v3705_v38, %v4064_v53  ;;  %vm2319_vm6 = vcmp.eq.s32.totalorder %v3788_v13, %v4064_v53  ;;  %vm2320_vm7 = vcmp.eq.s32.totalorder %v3791_v14, %v4064_v53 }
 0x336   :  { %2312 = vst [vmem:[#allocation6 + $0x2f0] sm:$0xff] %v2899_v44  ;;  %2313 = vst [vmem:[#allocation6 + $0x2f8] sm:$0xff] %v2900_v45  ;;  %vm2321_vm8 = vcmp.eq.s32.totalorder %v3794_v15, %v4064_v53  ;;  %v2901_v46 = vsel %vm2318_vm5, 1.0, %v3366_v10  ;;  %v2902_v47 = vsel %vm2319_vm6, 1.0, %v3366_v10  ;;  %v2903_v57 = vsel %vm2320_vm7, 1.0, %v3366_v10 }
 0x337   :  { %v2904_v48 = vsel %vm2321_vm8, 1.0, %v3366_v10  ;;  %2367 = vst [vmem:[#allocation6 + $0x300] sm:$0xff] %v2901_v46  ;;  %2368 = vst [vmem:[#allocation6 + $0x308] sm:$0xff] %v2902_v47  ;;  %vm2322_vm9 = vcmp.eq.s32.totalorder %v3797_v16, %v4064_v53  ;;  %vm2323_vm10 = vcmp.eq.s32.totalorder %v3800_v59, %v4064_v53  ;;  %vm2324_vm11 = vcmp.eq.s32.totalorder %v3803_v17, %v4064_v53 }
 0x338   :  { %2369 = vst [vmem:[#allocation6 + $0x310] sm:$0xff] %v2903_v57  ;;  %2370 = vst [vmem:[#allocation6 + $0x318] sm:$0xff] %v2904_v48  ;;  %vm2325_vm12 = vcmp.eq.s32.totalorder %v3806_v18, %v4064_v53  ;;  %v2905_v51 = vsel %vm2322_vm9, 1.0, %v3366_v10  ;;  %v2906_v55 = vsel %vm2323_vm10, 1.0, %v3366_v10  ;;  %v2907_v56 = vsel %vm2324_vm11, 1.0, %v3366_v10 }
 0x339   :  { %v2908_v58 = vsel %vm2325_vm12, 1.0, %v3366_v10  ;;  %2371 = vst [vmem:[#allocation6 + $0x320] sm:$0xff] %v2905_v51  ;;  %2372 = vst [vmem:[#allocation6 + $0x328] sm:$0xff] %v2906_v55  ;;  %vm2326_vm13 = vcmp.eq.s32.totalorder %v3810_v20, %v4064_v53  ;;  %vm2327_vm14 = vcmp.eq.s32.totalorder %v3813_v21, %v4064_v53  ;;  %vm2328_vm15 = vcmp.eq.s32.totalorder %v3816_v22, %v4064_v53 }
 0x33a   :  { %2373 = vst [vmem:[#allocation6 + $0x330] sm:$0xff] %v2907_v56  ;;  %2374 = vst [vmem:[#allocation6 + $0x338] sm:$0xff] %v2908_v58  ;;  %vm2329_vm0 = vcmp.eq.s32.totalorder %v3819_v23, %v4064_v53  ;;  %v2909_v60 = vsel %vm2326_vm13, 1.0, %v3366_v10  ;;  %v2910_v61 = vsel %vm2327_vm14, 1.0, %v3366_v10  ;;  %v2911_v63 = vsel %vm2328_vm15, 1.0, %v3366_v10 }
 0x33b   :  { %v2912_v0 = vsel %vm2329_vm0, 1.0, %v3366_v10  ;;  %2375 = vst [vmem:[#allocation6 + $0x340] sm:$0xff] %v2909_v60  ;;  %2376 = vst [vmem:[#allocation6 + $0x348] sm:$0xff] %v2910_v61  ;;  %vm2330_vm1 = vcmp.eq.s32.totalorder %v3822_v24, %v4064_v53  ;;  %vm2331_vm2 = vcmp.eq.s32.totalorder %v3825_v25, %v4064_v53  ;;  %vm2332_vm3 = vcmp.eq.s32.totalorder %v3828_v26, %v4064_v53 }
 0x33c   :  { %2377 = vst [vmem:[#allocation6 + $0x350] sm:$0xff] %v2911_v63  ;;  %2378 = vst [vmem:[#allocation6 + $0x358] sm:$0xff] %v2912_v0  ;;  %vm2333_vm4 = vcmp.eq.s32.totalorder %v3858_v40, %v4064_v53  ;;  %v2913_v52 = vsel %vm2330_vm1, 1.0, %v3366_v10  ;;  %v2914_v1 = vsel %vm2331_vm2, 1.0, %v3366_v10  ;;  %v2915_v2 = vsel %vm2332_vm3, 1.0, %v3366_v10 }
 0x33d   :  { %v2916_v3 = vsel %vm2333_vm4, 1.0, %v3366_v10  ;;  %2379 = vst [vmem:[#allocation6 + $0x360] sm:$0xff] %v2913_v52  ;;  %2380 = vst [vmem:[#allocation6 + $0x368] sm:$0xff] %v2914_v1  ;;  %vm2387_vm5 = vcmp.eq.s32.totalorder %v3705_v38, %v4069_v31  ;;  %vm2388_vm6 = vcmp.eq.s32.totalorder %v3788_v13, %v4069_v31  ;;  %vm2389_vm7 = vcmp.eq.s32.totalorder %v3791_v14, %v4069_v31 }
 0x33e   :  { %2381 = vst [vmem:[#allocation6 + $0x370] sm:$0xff] %v2915_v2  ;;  %2382 = vst [vmem:[#allocation6 + $0x378] sm:$0xff] %v2916_v3  ;;  %vm2390_vm8 = vcmp.eq.s32.totalorder %v3794_v15, %v4069_v31  ;;  %v2917_v4 = vsel %vm2387_vm5, 1.0, %v3366_v10  ;;  %v2918_v5 = vsel %vm2388_vm6, 1.0, %v3366_v10  ;;  %v2919_v6 = vsel %vm2389_vm7, 1.0, %v3366_v10 }
 0x33f   :  { %v2920_v7 = vsel %vm2390_vm8, 1.0, %v3366_v10  ;;  %2436 = vst [vmem:[#allocation6 + $0x380] sm:$0xff] %v2917_v4  ;;  %2437 = vst [vmem:[#allocation6 + $0x388] sm:$0xff] %v2918_v5  ;;  %vm2391_vm9 = vcmp.eq.s32.totalorder %v3797_v16, %v4069_v31  ;;  %vm2392_vm10 = vcmp.eq.s32.totalorder %v3800_v59, %v4069_v31  ;;  %vm2393_vm11 = vcmp.eq.s32.totalorder %v3803_v17, %v4069_v31 }
 0x340   :  { %2438 = vst [vmem:[#allocation6 + $0x390] sm:$0xff] %v2919_v6  ;;  %2439 = vst [vmem:[#allocation6 + $0x398] sm:$0xff] %v2920_v7  ;;  %vm2394_vm12 = vcmp.eq.s32.totalorder %v3806_v18, %v4069_v31  ;;  %v2921_v38 = vsel %vm2391_vm9, 1.0, %v3366_v10  ;;  %v2922_v13 = vsel %vm2392_vm10, 1.0, %v3366_v10  ;;  %v2923_v14 = vsel %vm2393_vm11, 1.0, %v3366_v10 }
 0x341   :  { %v2924_v15 = vsel %vm2394_vm12, 1.0, %v3366_v10  ;;  %2440 = vst [vmem:[#allocation6 + $0x3a0] sm:$0xff] %v2921_v38  ;;  %2441 = vst [vmem:[#allocation6 + $0x3a8] sm:$0xff] %v2922_v13  ;;  %vm2395_vm13 = vcmp.eq.s32.totalorder %v3810_v20, %v4069_v31  ;;  %vm2396_vm14 = vcmp.eq.s32.totalorder %v3813_v21, %v4069_v31  ;;  %vm2397_vm15 = vcmp.eq.s32.totalorder %v3816_v22, %v4069_v31 }
 0x342   :  { %2442 = vst [vmem:[#allocation6 + $0x3b0] sm:$0xff] %v2923_v14  ;;  %2443 = vst [vmem:[#allocation6 + $0x3b8] sm:$0xff] %v2924_v15  ;;  %vm2398_vm0 = vcmp.eq.s32.totalorder %v3819_v23, %v4069_v31  ;;  %v2925_v16 = vsel %vm2395_vm13, 1.0, %v3366_v10  ;;  %v2926_v59 = vsel %vm2396_vm14, 1.0, %v3366_v10  ;;  %v2927_v17 = vsel %vm2397_vm15, 1.0, %v3366_v10 }
 0x343   :  { %v2928_v18 = vsel %vm2398_vm0, 1.0, %v3366_v10  ;;  %2444 = vst [vmem:[#allocation6 + $0x3c0] sm:$0xff] %v2925_v16  ;;  %2445 = vst [vmem:[#allocation6 + $0x3c8] sm:$0xff] %v2926_v59  ;;  %vm2399_vm1 = vcmp.eq.s32.totalorder %v3822_v24, %v4069_v31  ;;  %vm2400_vm2 = vcmp.eq.s32.totalorder %v3825_v25, %v4069_v31  ;;  %vm2401_vm3 = vcmp.eq.s32.totalorder %v3828_v26, %v4069_v31 }
 0x344   :  { %2446 = vst [vmem:[#allocation6 + $0x3d0] sm:$0xff] %v2927_v17  ;;  %2447 = vst [vmem:[#allocation6 + $0x3d8] sm:$0xff] %v2928_v18  ;;  %vm2402_vm4 = vcmp.eq.s32.totalorder %v3858_v40, %v4069_v31  ;;  %v2929_v20 = vsel %vm2399_vm1, 1.0, %v3366_v10  ;;  %v2930_v21 = vsel %vm2400_vm2, 1.0, %v3366_v10  ;;  %v2931_v22 = vsel %vm2401_vm3, 1.0, %v3366_v10 }
 0x345   :  { %v2932_v23 = vsel %vm2402_vm4, 1.0, %v3366_v10  ;;  %2448 = vst [vmem:[#allocation6 + $0x3e0] sm:$0xff] %v2929_v20  ;;  %2449 = vst [vmem:[#allocation6 + $0x3e8] sm:$0xff] %v2930_v21 }
 0x346   :  { %2450 = vst [vmem:[#allocation6 + $0x3f0] sm:$0xff] %v2931_v22  ;;  %2451 = vst [vmem:[#allocation6 + $0x3f8] sm:$0xff] %v2932_v23 }
 0x347   :  { %3302 = shalt.err (!%p3299_p6)
}
 0x348   :  { %s3303_s26 = scalar_lea.hbm %s4216_s5, 16384 }
 0x349   :  { %p3304_p7 = scmp.ne.s32.totalorder %s4216_s5, %s3303_s26  ;;  %p3307_p8 = scmp.lt.u32.totalorder %s3303_s26, %s4216_s5 }
 0x34b   :  { %p3309_p9 = pnand %p3307_p8, %p3304_p7 }
 0x34d   :  { %3312 = shalt.err (!%p3309_p9)
}
 0x34e   :  { %s3371_s17 = smov 128   ;;  %s3372_s0 = smov 8  }
 0x34f   :  { %2463 = dma.vmem_to_hbm [thread:$0]  %s2458_s9, 16384, %s4216_s5, [#allocation7], %s3371_s17, %s3371_s17, %s3372_s0  }
 0x350   :  { %3339 = dma.done.wait [#allocation7], 16384  }
 0x351   :  { %3340 = vsyncadd [#allocation7], 4294950912 }
 0x352   :  { %2467 = vsyncpa [#allocation7], 1 }

</bundles_post_ra>
